<compile_context>
chip_gen: v7x
topology: tpu7x:2x2x1
jax: 0.10.0
libtpu: 0.0.40
codegen_flags: <defaults>
</compile_context>

<pallas_src>
import jax
import jax.numpy as jnp
import numpy as np
from jax.experimental import pallas as pl
from jax.experimental.pallas import tpu as pltpu  # noqa: F401  (not required at these shapes)


def _gate_math(pre, c_prev, H):
    """Reference-exact gate math for one direction. pre: (B, 4H), c_prev: (B, H)."""
    gates = jax.nn.sigmoid(pre[:, :3 * H])          # double-sigmoid quirk, see header
    i_t = jax.nn.sigmoid(gates[:, 0 * H:1 * H])
    f_t = jax.nn.sigmoid(gates[:, 1 * H:2 * H])
    o_t = jax.nn.sigmoid(gates[:, 2 * H:3 * H])
    g_t = jnp.tanh(pre[:, 3 * H:4 * H])
    c_new = f_t * c_prev + i_t * g_t
    h_new = o_t * jnp.tanh(c_new)
    return h_new, c_new


def _bilstm_kernel(x_ref, wih_ref, whh_ref, seq_ref, h_ref, c_ref):
    """Fused bidirectional LSTM over the full sequence in one invocation.

    x_ref   : (S*B, I)   time-major rows (row = t*B + b)
    wih_ref : (I, 8H)    [fwd gates i f o g | rev gates i f o g]   (128 lanes)
    whh_ref : (2H, 8H)   block-diagonal: rows [h_fwd; h_rev] -> same column layout
    seq_ref : (S, B, 2H) output hidden sequence [h_fwd | h_rev]
    h_ref   : (B, 2H)    final hidden
    c_ref   : (B, 2H)    final cell
    """
    S, B, H2 = seq_ref.shape
    H = H2 // 2
    G = 4 * H

    # Hoisted input projection for BOTH directions: one lane-dense MXU matmul
    # instead of 2*S tiny per-step matmuls.
    xw = jnp.dot(x_ref[...], wih_ref[...], preferred_element_type=jnp.float32)  # (S*B, 2G)
    whh = whh_ref[...]                                                           # (2H, 2G)

    h_cat = jnp.zeros((B, H2), jnp.float32)   # [h_fwd | h_rev]
    c_cat = jnp.zeros((B, H2), jnp.float32)   # [c_fwd | c_rev]

    # Time loop fully unrolled at trace time (S small & static): every index
    # below is a Python int, so all slices/stores lower statically.
    for t in range(S):
        # One MXU push drives both directions' recurrences (block-diag weights).
        hw = jnp.dot(h_cat, whh, preferred_element_type=jnp.float32)             # (B, 2G)
        # Forward consumes x[t]; reverse consumes x[S-1-t] (flip done by indexing).
        pre_f = xw[t * B:(t + 1) * B, :G] + hw[:, :G]
        pre_r = xw[(S - 1 - t) * B:(S - t) * B, G:] + hw[:, G:]

        h_f, c_f = _gate_math(pre_f, c_cat[:, :H], H)
        h_r, c_r = _gate_math(pre_r, c_cat[:, H:], H)

        h_cat = jnp.concatenate([h_f, h_r], axis=1)
        c_cat = jnp.concatenate([c_f, c_r], axis=1)
        seq_ref[t] = h_cat.astype(seq_ref.dtype)   # VMEM store; HBM writeback once at end

    h_ref[...] = h_cat.astype(h_ref.dtype)
    c_ref[...] = c_cat.astype(c_ref.dtype)


@jax.jit
def lstm_forward(x, params):
    """Bidirectional LSTM forward. x: (B, S, I). Returns (B,S,2H), ((B,2H),(B,2H))."""
    B, S, I = x.shape
    w_ih_f_t = params["w_ih_fwd_t"]   # (I, 4H)
    w_hh_f_t = params["w_hh_fwd_t"]   # (H, 4H)
    w_ih_r_t = params["w_ih_rev_t"]   # (I, 4H)
    w_hh_r_t = params["w_hh_rev_t"]   # (H, 4H)
    H = w_hh_f_t.shape[0]
    G = 4 * H
    dt = x.dtype

    # Time-major, row-flattened input (row = t*B + b).
    x2d = jnp.transpose(x, (1, 0, 2)).reshape(S * B, I)

    # Fused weights: column layout [fwd 4H | rev 4H] -> 8H (=128 for H=16) lanes.
    wih_cat = jnp.concatenate([w_ih_f_t, w_ih_r_t], axis=1)                       # (I, 8H)
    zeros = jnp.zeros((H, G), w_hh_f_t.dtype)
    whh_big = jnp.concatenate(
        [jnp.concatenate([w_hh_f_t, zeros], axis=1),     # rows for h_fwd
         jnp.concatenate([zeros, w_hh_r_t], axis=1)],    # rows for h_rev
        axis=0)                                          # (2H, 8H)

    seq, h_t, c_t = pl.pallas_call(
        _bilstm_kernel,
        out_shape=(
            jax.ShapeDtypeStruct((S, B, 2 * H), dt),
            jax.ShapeDtypeStruct((B, 2 * H), dt),
            jax.ShapeDtypeStruct((B, 2 * H), dt),
        ),
        # No grid / BlockSpecs: all operands are tiny and brought whole into VMEM.
    )(x2d, wih_cat, whh_big)

    hidden_seq = jnp.transpose(seq, (1, 0, 2))           # (B, S, 2H)
    return hidden_seq, (h_t, c_t)


def _reference_forward(x, params):
    """Pure-JAX reference reproducing the PyTorch module (incl. double-sigmoid
    on i/f/o and the un-reflipped reverse-direction output)."""
    def one_dir(xd, wih_t, whh_t):
        B, S, _ = xd.shape
        H = whh_t.shape[0]
        h = jnp.zeros((B, H), jnp.float32)
        c = jnp.zeros((B, H), jnp.float32)
        outs = []
        for t in range(S):
            preact = xd[:, t, :] @ wih_t + h @ whh_t
            gates = jax.nn.sigmoid(preact[:, :3 * H])
            i_t = jax.nn.sigmoid(gates[:, :H])
            f_t = jax.nn.sigmoid(gates[:, H:2 * H])
            o_t = jax.nn.sigmoid(gates[:, 2 * H:3 * H])
            g_t = jnp.tanh(preact[:, 3 * H:])
            c = f_t * c + i_t * g_t
            h = o_t * jnp.tanh(c)
            outs.append(h)
        return jnp.stack(outs, axis=1), h, c

    seq_f, h_f, c_f = one_dir(x, params["w_ih_fwd_t"], params["w_hh_fwd_t"])
    seq_r, h_r, c_r = one_dir(jnp.flip(x, axis=1),
                              params["w_ih_rev_t"], params["w_hh_rev_t"])
    return (jnp.concatenate([seq_f, seq_r], axis=2),
            (jnp.concatenate([h_f, h_r], axis=1),
             jnp.concatenate([c_f, c_r], axis=1)))


if __name__ == "__main__":
    # Module config: LSTM(input_size=16, hidden_size=32, bidirectional=True)
    # => per-direction hidden = 32 // 2 = 16, bias=False.
    B, S, I, HID = 2, 8, 16, 32
    H = HID // 2

    key = jax.random.PRNGKey(0)
    k = jax.random.split(key, 5)
    x = jax.random.normal(k[0], (B, S, I), jnp.float32)

    # nn.Linear weights are (out, in); store transposed (in, out) for y = x @ W^T.
    params = {
        "w_ih_fwd_t": (0.1 * jax.random.normal(k[1], (4 * H, I), jnp.float32)).T,
        "w_hh_fwd_t": (0.1 * jax.random.normal(k[2], (4 * H, H), jnp.float32)).T,
        "w_ih_rev_t": (0.1 * jax.random.normal(k[3], (4 * H, I), jnp.float32)).T,
        "w_hh_rev_t": (0.1 * jax.random.normal(k[4], (4 * H, H), jnp.float32)).T,
    }

    hidden_seq, (h_t, c_t) = lstm_forward(x, params)
    jax.block_until_ready((hidden_seq, h_t, c_t))

    ref_seq, (ref_h, ref_c) = _reference_forward(x, params)
    np.testing.assert_allclose(np.asarray(hidden_seq), np.asarray(ref_seq),
                               rtol=1e-5, atol=1e-5)
    np.testing.assert_allclose(np.asarray(h_t), np.asarray(ref_h), rtol=1e-5, atol=1e-5)
    np.testing.assert_allclose(np.asarray(c_t), np.asarray(ref_c), rtol=1e-5, atol=1e-5)

    assert hidden_seq.shape == (B, S, HID)
    assert h_t.shape == (B, HID) and c_t.shape == (B, HID)
    print("KERNEL_OK")
</pallas_src>

<mosaic_0001>
module attributes {stable_mosaic.version = 11 : i64} {
  func.func @_bilstm_kernel(%arg0: memref<16x16xf32, #tpu.memory_space<vmem>>, %arg1: memref<16x128xf32, #tpu.memory_space<vmem>>, %arg2: memref<32x128xf32, #tpu.memory_space<vmem>>, %arg3: memref<8x2x32xf32, #tpu.memory_space<vmem>>, %arg4: memref<2x32xf32, #tpu.memory_space<vmem>>, %arg5: memref<2x32xf32, #tpu.memory_space<vmem>>) attributes {dimension_semantics = [], scalar_prefetch = 0 : i64, scratch_operands = 0 : i64, tpu.core_type = #tpu.core_type<tc>} {
    %c0 = arith.constant 0 : index
    %c0_0 = arith.constant 0 : index
    %0 = vector.load %arg0[%c0, %c0_0] : memref<16x16xf32, #tpu.memory_space<vmem>>, vector<16x16xf32>
    %c0_1 = arith.constant 0 : index
    %c0_2 = arith.constant 0 : index
    %1 = vector.load %arg1[%c0_1, %c0_2] : memref<16x128xf32, #tpu.memory_space<vmem>>, vector<16x128xf32>
    %cst = arith.constant dense<0.000000e+00> : vector<16x128xf32>
    %2 = tpu.matmul %0, %1, %cst {dimension_numbers = #tpu.dot_dimension_numbers<[1], [0], [0], [1], [0, 0, 1, 1], [], []>} : vector<16x16xf32>, vector<16x128xf32>, vector<16x128xf32> -> vector<16x128xf32>
    %c0_3 = arith.constant 0 : index
    %c0_4 = arith.constant 0 : index
    %3 = vector.load %arg2[%c0_3, %c0_4] : memref<32x128xf32, #tpu.memory_space<vmem>>, vector<32x128xf32>
    %cst_5 = arith.constant 0.000000e+00 : f32
    %4 = vector.broadcast %cst_5 : f32 to vector<2x32xf32>
    %cst_6 = arith.constant 0.000000e+00 : f32
    %5 = vector.broadcast %cst_6 : f32 to vector<2x32xf32>
    %cst_7 = arith.constant dense<0.000000e+00> : vector<2x128xf32>
    %6 = tpu.matmul %4, %3, %cst_7 {dimension_numbers = #tpu.dot_dimension_numbers<[1], [0], [0], [1], [0, 0, 1, 1], [], []>} : vector<2x32xf32>, vector<32x128xf32>, vector<2x128xf32> -> vector<2x128xf32>
    %7 = vector.extract_strided_slice %2 {offsets = [0, 0], sizes = [2, 64], strides = [1, 1]} : vector<16x128xf32> to vector<2x64xf32>
    %8 = vector.extract_strided_slice %6 {offsets = [0, 0], sizes = [2, 64], strides = [1, 1]} : vector<2x128xf32> to vector<2x64xf32>
    %9 = arith.addf %7, %8 : vector<2x64xf32>
    %10 = vector.extract_strided_slice %2 {offsets = [14, 64], sizes = [2, 64], strides = [1, 1]} : vector<16x128xf32> to vector<2x64xf32>
    %11 = vector.extract_strided_slice %6 {offsets = [0, 64], sizes = [2, 64], strides = [1, 1]} : vector<2x128xf32> to vector<2x64xf32>
    %12 = arith.addf %10, %11 : vector<2x64xf32>
    %13 = vector.extract_strided_slice %5 {offsets = [0, 0], sizes = [2, 16], strides = [1, 1]} : vector<2x32xf32> to vector<2x16xf32>
    %14 = vector.extract_strided_slice %9 {offsets = [0, 0], sizes = [2, 48], strides = [1, 1]} : vector<2x64xf32> to vector<2x48xf32>
    %15 = arith.negf %14 : vector<2x48xf32>
    %16 = math.exp %15 : vector<2x48xf32>
    %cst_8 = arith.constant 1.000000e+00 : f32
    %17 = vector.broadcast %cst_8 : f32 to vector<2x48xf32>
    %18 = arith.addf %17, %16 : vector<2x48xf32>
    %19 = arith.divf %17, %18 : vector<2x48xf32>
    %20 = vector.extract_strided_slice %19 {offsets = [0, 0], sizes = [2, 16], strides = [1, 1]} : vector<2x48xf32> to vector<2x16xf32>
    %21 = arith.negf %20 : vector<2x16xf32>
    %22 = math.exp %21 : vector<2x16xf32>
    %cst_9 = arith.constant 1.000000e+00 : f32
    %23 = vector.broadcast %cst_9 : f32 to vector<2x16xf32>
    %24 = arith.addf %23, %22 : vector<2x16xf32>
    %25 = arith.divf %23, %24 : vector<2x16xf32>
    %26 = vector.extract_strided_slice %19 {offsets = [0, 16], sizes = [2, 16], strides = [1, 1]} : vector<2x48xf32> to vector<2x16xf32>
    %27 = arith.negf %26 : vector<2x16xf32>
    %28 = math.exp %27 : vector<2x16xf32>
    %cst_10 = arith.constant 1.000000e+00 : f32
    %29 = vector.broadcast %cst_10 : f32 to vector<2x16xf32>
    %30 = arith.addf %29, %28 : vector<2x16xf32>
    %31 = arith.divf %29, %30 : vector<2x16xf32>
    %32 = vector.extract_strided_slice %19 {offsets = [0, 32], sizes = [2, 16], strides = [1, 1]} : vector<2x48xf32> to vector<2x16xf32>
    %33 = arith.negf %32 : vector<2x16xf32>
    %34 = math.exp %33 : vector<2x16xf32>
    %cst_11 = arith.constant 1.000000e+00 : f32
    %35 = vector.broadcast %cst_11 : f32 to vector<2x16xf32>
    %36 = arith.addf %35, %34 : vector<2x16xf32>
    %37 = arith.divf %35, %36 : vector<2x16xf32>
    %38 = vector.extract_strided_slice %9 {offsets = [0, 48], sizes = [2, 16], strides = [1, 1]} : vector<2x64xf32> to vector<2x16xf32>
    %39 = math.tanh %38 : vector<2x16xf32>
    %40 = arith.mulf %31, %13 : vector<2x16xf32>
    %41 = arith.mulf %25, %39 : vector<2x16xf32>
    %42 = arith.addf %40, %41 : vector<2x16xf32>
    %43 = math.tanh %42 : vector<2x16xf32>
    %44 = arith.mulf %37, %43 : vector<2x16xf32>
    %45 = vector.extract_strided_slice %5 {offsets = [0, 16], sizes = [2, 16], strides = [1, 1]} : vector<2x32xf32> to vector<2x16xf32>
    %46 = vector.extract_strided_slice %12 {offsets = [0, 0], sizes = [2, 48], strides = [1, 1]} : vector<2x64xf32> to vector<2x48xf32>
    %47 = arith.negf %46 : vector<2x48xf32>
    %48 = math.exp %47 : vector<2x48xf32>
    %cst_12 = arith.constant 1.000000e+00 : f32
    %49 = vector.broadcast %cst_12 : f32 to vector<2x48xf32>
    %50 = arith.addf %49, %48 : vector<2x48xf32>
    %51 = arith.divf %49, %50 : vector<2x48xf32>
    %52 = vector.extract_strided_slice %51 {offsets = [0, 0], sizes = [2, 16], strides = [1, 1]} : vector<2x48xf32> to vector<2x16xf32>
    %53 = arith.negf %52 : vector<2x16xf32>
    %54 = math.exp %53 : vector<2x16xf32>
    %cst_13 = arith.constant 1.000000e+00 : f32
    %55 = vector.broadcast %cst_13 : f32 to vector<2x16xf32>
    %56 = arith.addf %55, %54 : vector<2x16xf32>
    %57 = arith.divf %55, %56 : vector<2x16xf32>
    %58 = vector.extract_strided_slice %51 {offsets = [0, 16], sizes = [2, 16], strides = [1, 1]} : vector<2x48xf32> to vector<2x16xf32>
    %59 = arith.negf %58 : vector<2x16xf32>
    %60 = math.exp %59 : vector<2x16xf32>
    %cst_14 = arith.constant 1.000000e+00 : f32
    %61 = vector.broadcast %cst_14 : f32 to vector<2x16xf32>
    %62 = arith.addf %61, %60 : vector<2x16xf32>
    %63 = arith.divf %61, %62 : vector<2x16xf32>
    %64 = vector.extract_strided_slice %51 {offsets = [0, 32], sizes = [2, 16], strides = [1, 1]} : vector<2x48xf32> to vector<2x16xf32>
    %65 = arith.negf %64 : vector<2x16xf32>
    %66 = math.exp %65 : vector<2x16xf32>
    %cst_15 = arith.constant 1.000000e+00 : f32
    %67 = vector.broadcast %cst_15 : f32 to vector<2x16xf32>
    %68 = arith.addf %67, %66 : vector<2x16xf32>
    %69 = arith.divf %67, %68 : vector<2x16xf32>
    %70 = vector.extract_strided_slice %12 {offsets = [0, 48], sizes = [2, 16], strides = [1, 1]} : vector<2x64xf32> to vector<2x16xf32>
    %71 = math.tanh %70 : vector<2x16xf32>
    %72 = arith.mulf %63, %45 : vector<2x16xf32>
    %73 = arith.mulf %57, %71 : vector<2x16xf32>
    %74 = arith.addf %72, %73 : vector<2x16xf32>
    %75 = math.tanh %74 : vector<2x16xf32>
    %76 = arith.mulf %69, %75 : vector<2x16xf32>
    %77 = tpu.concatenate %44, %76 in 1 : vector<2x16xf32>, vector<2x16xf32> -> vector<2x32xf32>
    %78 = tpu.concatenate %42, %74 in 1 : vector<2x16xf32>, vector<2x16xf32> -> vector<2x32xf32>
    %c0_16 = arith.constant 0 : index
    %c0_17 = arith.constant 0 : index
    %c0_18 = arith.constant 0 : index
    %79 = vector.load %arg3[%c0_16, %c0_17, %c0_18] : memref<8x2x32xf32, #tpu.memory_space<vmem>>, vector<1x2x32xf32>
    %80 = vector.shape_cast %79 : vector<1x2x32xf32> to vector<2x32xf32>
    %81 = vector.shape_cast %77 : vector<2x32xf32> to vector<1x2x32xf32>
    tpu.vector_store %arg3[%c0_16, %c0_17, %c0_18], %81 {strides = array<i32>} : memref<8x2x32xf32, #tpu.memory_space<vmem>>, vector<1x2x32xf32>,
    %cst_19 = arith.constant dense<0.000000e+00> : vector<2x128xf32>
    %82 = tpu.matmul %77, %3, %cst_19 {dimension_numbers = #tpu.dot_dimension_numbers<[1], [0], [0], [1], [0, 0, 1, 1], [], []>} : vector<2x32xf32>, vector<32x128xf32>, vector<2x128xf32> -> vector<2x128xf32>
    %83 = vector.extract_strided_slice %2 {offsets = [2, 0], sizes = [2, 64], strides = [1, 1]} : vector<16x128xf32> to vector<2x64xf32>
    %84 = vector.extract_strided_slice %82 {offsets = [0, 0], sizes = [2, 64], strides = [1, 1]} : vector<2x128xf32> to vector<2x64xf32>
    %85 = arith.addf %83, %84 : vector<2x64xf32>
    %86 = vector.extract_strided_slice %2 {offsets = [12, 64], sizes = [2, 64], strides = [1, 1]} : vector<16x128xf32> to vector<2x64xf32>
    %87 = vector.extract_strided_slice %82 {offsets = [0, 64], sizes = [2, 64], strides = [1, 1]} : vector<2x128xf32> to vector<2x64xf32>
    %88 = arith.addf %86, %87 : vector<2x64xf32>
    %89 = vector.extract_strided_slice %78 {offsets = [0, 0], sizes = [2, 16], strides = [1, 1]} : vector<2x32xf32> to vector<2x16xf32>
    %90 = vector.extract_strided_slice %85 {offsets = [0, 0], sizes = [2, 48], strides = [1, 1]} : vector<2x64xf32> to vector<2x48xf32>
    %91 = arith.negf %90 : vector<2x48xf32>
    %92 = math.exp %91 : vector<2x48xf32>
    %cst_20 = arith.constant 1.000000e+00 : f32
    %93 = vector.broadcast %cst_20 : f32 to vector<2x48xf32>
    %94 = arith.addf %93, %92 : vector<2x48xf32>
    %95 = arith.divf %93, %94 : vector<2x48xf32>
    %96 = vector.extract_strided_slice %95 {offsets = [0, 0], sizes = [2, 16], strides = [1, 1]} : vector<2x48xf32> to vector<2x16xf32>
    %97 = arith.negf %96 : vector<2x16xf32>
    %98 = math.exp %97 : vector<2x16xf32>
    %cst_21 = arith.constant 1.000000e+00 : f32
    %99 = vector.broadcast %cst_21 : f32 to vector<2x16xf32>
    %100 = arith.addf %99, %98 : vector<2x16xf32>
    %101 = arith.divf %99, %100 : vector<2x16xf32>
    %102 = vector.extract_strided_slice %95 {offsets = [0, 16], sizes = [2, 16], strides = [1, 1]} : vector<2x48xf32> to vector<2x16xf32>
    %103 = arith.negf %102 : vector<2x16xf32>
    %104 = math.exp %103 : vector<2x16xf32>
    %cst_22 = arith.constant 1.000000e+00 : f32
    %105 = vector.broadcast %cst_22 : f32 to vector<2x16xf32>
    %106 = arith.addf %105, %104 : vector<2x16xf32>
    %107 = arith.divf %105, %106 : vector<2x16xf32>
    %108 = vector.extract_strided_slice %95 {offsets = [0, 32], sizes = [2, 16], strides = [1, 1]} : vector<2x48xf32> to vector<2x16xf32>
    %109 = arith.negf %108 : vector<2x16xf32>
    %110 = math.exp %109 : vector<2x16xf32>
    %cst_23 = arith.constant 1.000000e+00 : f32
    %111 = vector.broadcast %cst_23 : f32 to vector<2x16xf32>
    %112 = arith.addf %111, %110 : vector<2x16xf32>
    %113 = arith.divf %111, %112 : vector<2x16xf32>
    %114 = vector.extract_strided_slice %85 {offsets = [0, 48], sizes = [2, 16], strides = [1, 1]} : vector<2x64xf32> to vector<2x16xf32>
    %115 = math.tanh %114 : vector<2x16xf32>
    %116 = arith.mulf %107, %89 : vector<2x16xf32>
    %117 = arith.mulf %101, %115 : vector<2x16xf32>
    %118 = arith.addf %116, %117 : vector<2x16xf32>
    %119 = math.tanh %118 : vector<2x16xf32>
    %120 = arith.mulf %113, %119 : vector<2x16xf32>
    %121 = vector.extract_strided_slice %78 {offsets = [0, 16], sizes = [2, 16], strides = [1, 1]} : vector<2x32xf32> to vector<2x16xf32>
    %122 = vector.extract_strided_slice %88 {offsets = [0, 0], sizes = [2, 48], strides = [1, 1]} : vector<2x64xf32> to vector<2x48xf32>
    %123 = arith.negf %122 : vector<2x48xf32>
    %124 = math.exp %123 : vector<2x48xf32>
    %cst_24 = arith.constant 1.000000e+00 : f32
    %125 = vector.broadcast %cst_24 : f32 to vector<2x48xf32>
    %126 = arith.addf %125, %124 : vector<2x48xf32>
    %127 = arith.divf %125, %126 : vector<2x48xf32>
    %128 = vector.extract_strided_slice %127 {offsets = [0, 0], sizes = [2, 16], strides = [1, 1]} : vector<2x48xf32> to vector<2x16xf32>
    %129 = arith.negf %128 : vector<2x16xf32>
    %130 = math.exp %129 : vector<2x16xf32>
    %cst_25 = arith.constant 1.000000e+00 : f32
    %131 = vector.broadcast %cst_25 : f32 to vector<2x16xf32>
    %132 = arith.addf %131, %130 : vector<2x16xf32>
    %133 = arith.divf %131, %132 : vector<2x16xf32>
    %134 = vector.extract_strided_slice %127 {offsets = [0, 16], sizes = [2, 16], strides = [1, 1]} : vector<2x48xf32> to vector<2x16xf32>
    %135 = arith.negf %134 : vector<2x16xf32>
    %136 = math.exp %135 : vector<2x16xf32>
    %cst_26 = arith.constant 1.000000e+00 : f32
    %137 = vector.broadcast %cst_26 : f32 to vector<2x16xf32>
    %138 = arith.addf %137, %136 : vector<2x16xf32>
    %139 = arith.divf %137, %138 : vector<2x16xf32>
    %140 = vector.extract_strided_slice %127 {offsets = [0, 32], sizes = [2, 16], strides = [1, 1]} : vector<2x48xf32> to vector<2x16xf32>
    %141 = arith.negf %140 : vector<2x16xf32>
    %142 = math.exp %141 : vector<2x16xf32>
    %cst_27 = arith.constant 1.000000e+00 : f32
    %143 = vector.broadcast %cst_27 : f32 to vector<2x16xf32>
    %144 = arith.addf %143, %142 : vector<2x16xf32>
    %145 = arith.divf %143, %144 : vector<2x16xf32>
    %146 = vector.extract_strided_slice %88 {offsets = [0, 48], sizes = [2, 16], strides = [1, 1]} : vector<2x64xf32> to vector<2x16xf32>
    %147 = math.tanh %146 : vector<2x16xf32>
    %148 = arith.mulf %139, %121 : vector<2x16xf32>
    %149 = arith.mulf %133, %147 : vector<2x16xf32>
    %150 = arith.addf %148, %149 : vector<2x16xf32>
    %151 = math.tanh %150 : vector<2x16xf32>
    %152 = arith.mulf %145, %151 : vector<2x16xf32>
    %153 = tpu.concatenate %120, %152 in 1 : vector<2x16xf32>, vector<2x16xf32> -> vector<2x32xf32>
    %154 = tpu.concatenate %118, %150 in 1 : vector<2x16xf32>, vector<2x16xf32> -> vector<2x32xf32>
    %c1 = arith.constant 1 : index
    %c0_28 = arith.constant 0 : index
    %c0_29 = arith.constant 0 : index
    %155 = vector.load %arg3[%c1, %c0_28, %c0_29] : memref<8x2x32xf32, #tpu.memory_space<vmem>>, vector<1x2x32xf32>
    %156 = vector.shape_cast %155 : vector<1x2x32xf32> to vector<2x32xf32>
    %157 = vector.shape_cast %153 : vector<2x32xf32> to vector<1x2x32xf32>
    tpu.vector_store %arg3[%c1, %c0_28, %c0_29], %157 {strides = array<i32>} : memref<8x2x32xf32, #tpu.memory_space<vmem>>, vector<1x2x32xf32>,
    %cst_30 = arith.constant dense<0.000000e+00> : vector<2x128xf32>
    %158 = tpu.matmul %153, %3, %cst_30 {dimension_numbers = #tpu.dot_dimension_numbers<[1], [0], [0], [1], [0, 0, 1, 1], [], []>} : vector<2x32xf32>, vector<32x128xf32>, vector<2x128xf32> -> vector<2x128xf32>
    %159 = vector.extract_strided_slice %2 {offsets = [4, 0], sizes = [2, 64], strides = [1, 1]} : vector<16x128xf32> to vector<2x64xf32>
    %160 = vector.extract_strided_slice %158 {offsets = [0, 0], sizes = [2, 64], strides = [1, 1]} : vector<2x128xf32> to vector<2x64xf32>
    %161 = arith.addf %159, %160 : vector<2x64xf32>
    %162 = vector.extract_strided_slice %2 {offsets = [10, 64], sizes = [2, 64], strides = [1, 1]} : vector<16x128xf32> to vector<2x64xf32>
    %163 = vector.extract_strided_slice %158 {offsets = [0, 64], sizes = [2, 64], strides = [1, 1]} : vector<2x128xf32> to vector<2x64xf32>
    %164 = arith.addf %162, %163 : vector<2x64xf32>
    %165 = vector.extract_strided_slice %154 {offsets = [0, 0], sizes = [2, 16], strides = [1, 1]} : vector<2x32xf32> to vector<2x16xf32>
    %166 = vector.extract_strided_slice %161 {offsets = [0, 0], sizes = [2, 48], strides = [1, 1]} : vector<2x64xf32> to vector<2x48xf32>
    %167 = arith.negf %166 : vector<2x48xf32>
    %168 = math.exp %167 : vector<2x48xf32>
    %cst_31 = arith.constant 1.000000e+00 : f32
    %169 = vector.broadcast %cst_31 : f32 to vector<2x48xf32>
    %170 = arith.addf %169, %168 : vector<2x48xf32>
    %171 = arith.divf %169, %170 : vector<2x48xf32>
    %172 = vector.extract_strided_slice %171 {offsets = [0, 0], sizes = [2, 16], strides = [1, 1]} : vector<2x48xf32> to vector<2x16xf32>
    %173 = arith.negf %172 : vector<2x16xf32>
    %174 = math.exp %173 : vector<2x16xf32>
    %cst_32 = arith.constant 1.000000e+00 : f32
    %175 = vector.broadcast %cst_32 : f32 to vector<2x16xf32>
    %176 = arith.addf %175, %174 : vector<2x16xf32>
    %177 = arith.divf %175, %176 : vector<2x16xf32>
    %178 = vector.extract_strided_slice %171 {offsets = [0, 16], sizes = [2, 16], strides = [1, 1]} : vector<2x48xf32> to vector<2x16xf32>
    %179 = arith.negf %178 : vector<2x16xf32>
    %180 = math.exp %179 : vector<2x16xf32>
    %cst_33 = arith.constant 1.000000e+00 : f32
    %181 = vector.broadcast %cst_33 : f32 to vector<2x16xf32>
    %182 = arith.addf %181, %180 : vector<2x16xf32>
    %183 = arith.divf %181, %182 : vector<2x16xf32>
    %184 = vector.extract_strided_slice %171 {offsets = [0, 32], sizes = [2, 16], strides = [1, 1]} : vector<2x48xf32> to vector<2x16xf32>
    %185 = arith.negf %184 : vector<2x16xf32>
    %186 = math.exp %185 : vector<2x16xf32>
    %cst_34 = arith.constant 1.000000e+00 : f32
    %187 = vector.broadcast %cst_34 : f32 to vector<2x16xf32>
    %188 = arith.addf %187, %186 : vector<2x16xf32>
    %189 = arith.divf %187, %188 : vector<2x16xf32>
    %190 = vector.extract_strided_slice %161 {offsets = [0, 48], sizes = [2, 16], strides = [1, 1]} : vector<2x64xf32> to vector<2x16xf32>
    %191 = math.tanh %190 : vector<2x16xf32>
    %192 = arith.mulf %183, %165 : vector<2x16xf32>
    %193 = arith.mulf %177, %191 : vector<2x16xf32>
    %194 = arith.addf %192, %193 : vector<2x16xf32>
    %195 = math.tanh %194 : vector<2x16xf32>
    %196 = arith.mulf %189, %195 : vector<2x16xf32>
    %197 = vector.extract_strided_slice %154 {offsets = [0, 16], sizes = [2, 16], strides = [1, 1]} : vector<2x32xf32> to vector<2x16xf32>
    %198 = vector.extract_strided_slice %164 {offsets = [0, 0], sizes = [2, 48], strides = [1, 1]} : vector<2x64xf32> to vector<2x48xf32>
    %199 = arith.negf %198 : vector<2x48xf32>
    %200 = math.exp %199 : vector<2x48xf32>
    %cst_35 = arith.constant 1.000000e+00 : f32
    %201 = vector.broadcast %cst_35 : f32 to vector<2x48xf32>
    %202 = arith.addf %201, %200 : vector<2x48xf32>
    %203 = arith.divf %201, %202 : vector<2x48xf32>
    %204 = vector.extract_strided_slice %203 {offsets = [0, 0], sizes = [2, 16], strides = [1, 1]} : vector<2x48xf32> to vector<2x16xf32>
    %205 = arith.negf %204 : vector<2x16xf32>
    %206 = math.exp %205 : vector<2x16xf32>
    %cst_36 = arith.constant 1.000000e+00 : f32
    %207 = vector.broadcast %cst_36 : f32 to vector<2x16xf32>
    %208 = arith.addf %207, %206 : vector<2x16xf32>
    %209 = arith.divf %207, %208 : vector<2x16xf32>
    %210 = vector.extract_strided_slice %203 {offsets = [0, 16], sizes = [2, 16], strides = [1, 1]} : vector<2x48xf32> to vector<2x16xf32>
    %211 = arith.negf %210 : vector<2x16xf32>
    %212 = math.exp %211 : vector<2x16xf32>
    %cst_37 = arith.constant 1.000000e+00 : f32
    %213 = vector.broadcast %cst_37 : f32 to vector<2x16xf32>
    %214 = arith.addf %213, %212 : vector<2x16xf32>
    %215 = arith.divf %213, %214 : vector<2x16xf32>
    %216 = vector.extract_strided_slice %203 {offsets = [0, 32], sizes = [2, 16], strides = [1, 1]} : vector<2x48xf32> to vector<2x16xf32>
    %217 = arith.negf %216 : vector<2x16xf32>
    %218 = math.exp %217 : vector<2x16xf32>
    %cst_38 = arith.constant 1.000000e+00 : f32
    %219 = vector.broadcast %cst_38 : f32 to vector<2x16xf32>
    %220 = arith.addf %219, %218 : vector<2x16xf32>
    %221 = arith.divf %219, %220 : vector<2x16xf32>
    %222 = vector.extract_strided_slice %164 {offsets = [0, 48], sizes = [2, 16], strides = [1, 1]} : vector<2x64xf32> to vector<2x16xf32>
    %223 = math.tanh %222 : vector<2x16xf32>
    %224 = arith.mulf %215, %197 : vector<2x16xf32>
    %225 = arith.mulf %209, %223 : vector<2x16xf32>
    %226 = arith.addf %224, %225 : vector<2x16xf32>
    %227 = math.tanh %226 : vector<2x16xf32>
    %228 = arith.mulf %221, %227 : vector<2x16xf32>
    %229 = tpu.concatenate %196, %228 in 1 : vector<2x16xf32>, vector<2x16xf32> -> vector<2x32xf32>
    %230 = tpu.concatenate %194, %226 in 1 : vector<2x16xf32>, vector<2x16xf32> -> vector<2x32xf32>
    %c2 = arith.constant 2 : index
    %c0_39 = arith.constant 0 : index
    %c0_40 = arith.constant 0 : index
    %231 = vector.load %arg3[%c2, %c0_39, %c0_40] : memref<8x2x32xf32, #tpu.memory_space<vmem>>, vector<1x2x32xf32>
    %232 = vector.shape_cast %231 : vector<1x2x32xf32> to vector<2x32xf32>
    %233 = vector.shape_cast %229 : vector<2x32xf32> to vector<1x2x32xf32>
    tpu.vector_store %arg3[%c2, %c0_39, %c0_40], %233 {strides = array<i32>} : memref<8x2x32xf32, #tpu.memory_space<vmem>>, vector<1x2x32xf32>,
    %cst_41 = arith.constant dense<0.000000e+00> : vector<2x128xf32>
    %234 = tpu.matmul %229, %3, %cst_41 {dimension_numbers = #tpu.dot_dimension_numbers<[1], [0], [0], [1], [0, 0, 1, 1], [], []>} : vector<2x32xf32>, vector<32x128xf32>, vector<2x128xf32> -> vector<2x128xf32>
    %235 = vector.extract_strided_slice %2 {offsets = [6, 0], sizes = [2, 64], strides = [1, 1]} : vector<16x128xf32> to vector<2x64xf32>
    %236 = vector.extract_strided_slice %234 {offsets = [0, 0], sizes = [2, 64], strides = [1, 1]} : vector<2x128xf32> to vector<2x64xf32>
    %237 = arith.addf %235, %236 : vector<2x64xf32>
    %238 = vector.extract_strided_slice %2 {offsets = [8, 64], sizes = [2, 64], strides = [1, 1]} : vector<16x128xf32> to vector<2x64xf32>
    %239 = vector.extract_strided_slice %234 {offsets = [0, 64], sizes = [2, 64], strides = [1, 1]} : vector<2x128xf32> to vector<2x64xf32>
    %240 = arith.addf %238, %239 : vector<2x64xf32>
    %241 = vector.extract_strided_slice %230 {offsets = [0, 0], sizes = [2, 16], strides = [1, 1]} : vector<2x32xf32> to vector<2x16xf32>
    %242 = vector.extract_strided_slice %237 {offsets = [0, 0], sizes = [2, 48], strides = [1, 1]} : vector<2x64xf32> to vector<2x48xf32>
    %243 = arith.negf %242 : vector<2x48xf32>
    %244 = math.exp %243 : vector<2x48xf32>
    %cst_42 = arith.constant 1.000000e+00 : f32
    %245 = vector.broadcast %cst_42 : f32 to vector<2x48xf32>
    %246 = arith.addf %245, %244 : vector<2x48xf32>
    %247 = arith.divf %245, %246 : vector<2x48xf32>
    %248 = vector.extract_strided_slice %247 {offsets = [0, 0], sizes = [2, 16], strides = [1, 1]} : vector<2x48xf32> to vector<2x16xf32>
    %249 = arith.negf %248 : vector<2x16xf32>
    %250 = math.exp %249 : vector<2x16xf32>
    %cst_43 = arith.constant 1.000000e+00 : f32
    %251 = vector.broadcast %cst_43 : f32 to vector<2x16xf32>
    %252 = arith.addf %251, %250 : vector<2x16xf32>
    %253 = arith.divf %251, %252 : vector<2x16xf32>
    %254 = vector.extract_strided_slice %247 {offsets = [0, 16], sizes = [2, 16], strides = [1, 1]} : vector<2x48xf32> to vector<2x16xf32>
    %255 = arith.negf %254 : vector<2x16xf32>
    %256 = math.exp %255 : vector<2x16xf32>
    %cst_44 = arith.constant 1.000000e+00 : f32
    %257 = vector.broadcast %cst_44 : f32 to vector<2x16xf32>
    %258 = arith.addf %257, %256 : vector<2x16xf32>
    %259 = arith.divf %257, %258 : vector<2x16xf32>
    %260 = vector.extract_strided_slice %247 {offsets = [0, 32], sizes = [2, 16], strides = [1, 1]} : vector<2x48xf32> to vector<2x16xf32>
    %261 = arith.negf %260 : vector<2x16xf32>
    %262 = math.exp %261 : vector<2x16xf32>
    %cst_45 = arith.constant 1.000000e+00 : f32
    %263 = vector.broadcast %cst_45 : f32 to vector<2x16xf32>
    %264 = arith.addf %263, %262 : vector<2x16xf32>
    %265 = arith.divf %263, %264 : vector<2x16xf32>
    %266 = vector.extract_strided_slice %237 {offsets = [0, 48], sizes = [2, 16], strides = [1, 1]} : vector<2x64xf32> to vector<2x16xf32>
    %267 = math.tanh %266 : vector<2x16xf32>
    %268 = arith.mulf %259, %241 : vector<2x16xf32>
    %269 = arith.mulf %253, %267 : vector<2x16xf32>
    %270 = arith.addf %268, %269 : vector<2x16xf32>
    %271 = math.tanh %270 : vector<2x16xf32>
    %272 = arith.mulf %265, %271 : vector<2x16xf32>
    %273 = vector.extract_strided_slice %230 {offsets = [0, 16], sizes = [2, 16], strides = [1, 1]} : vector<2x32xf32> to vector<2x16xf32>
    %274 = vector.extract_strided_slice %240 {offsets = [0, 0], sizes = [2, 48], strides = [1, 1]} : vector<2x64xf32> to vector<2x48xf32>
    %275 = arith.negf %274 : vector<2x48xf32>
    %276 = math.exp %275 : vector<2x48xf32>
    %cst_46 = arith.constant 1.000000e+00 : f32
    %277 = vector.broadcast %cst_46 : f32 to vector<2x48xf32>
    %278 = arith.addf %277, %276 : vector<2x48xf32>
    %279 = arith.divf %277, %278 : vector<2x48xf32>
    %280 = vector.extract_strided_slice %279 {offsets = [0, 0], sizes = [2, 16], strides = [1, 1]} : vector<2x48xf32> to vector<2x16xf32>
    %281 = arith.negf %280 : vector<2x16xf32>
    %282 = math.exp %281 : vector<2x16xf32>
    %cst_47 = arith.constant 1.000000e+00 : f32
    %283 = vector.broadcast %cst_47 : f32 to vector<2x16xf32>
    %284 = arith.addf %283, %282 : vector<2x16xf32>
    %285 = arith.divf %283, %284 : vector<2x16xf32>
    %286 = vector.extract_strided_slice %279 {offsets = [0, 16], sizes = [2, 16], strides = [1, 1]} : vector<2x48xf32> to vector<2x16xf32>
    %287 = arith.negf %286 : vector<2x16xf32>
    %288 = math.exp %287 : vector<2x16xf32>
    %cst_48 = arith.constant 1.000000e+00 : f32
    %289 = vector.broadcast %cst_48 : f32 to vector<2x16xf32>
    %290 = arith.addf %289, %288 : vector<2x16xf32>
    %291 = arith.divf %289, %290 : vector<2x16xf32>
    %292 = vector.extract_strided_slice %279 {offsets = [0, 32], sizes = [2, 16], strides = [1, 1]} : vector<2x48xf32> to vector<2x16xf32>
    %293 = arith.negf %292 : vector<2x16xf32>
    %294 = math.exp %293 : vector<2x16xf32>
    %cst_49 = arith.constant 1.000000e+00 : f32
    %295 = vector.broadcast %cst_49 : f32 to vector<2x16xf32>
    %296 = arith.addf %295, %294 : vector<2x16xf32>
    %297 = arith.divf %295, %296 : vector<2x16xf32>
    %298 = vector.extract_strided_slice %240 {offsets = [0, 48], sizes = [2, 16], strides = [1, 1]} : vector<2x64xf32> to vector<2x16xf32>
    %299 = math.tanh %298 : vector<2x16xf32>
    %300 = arith.mulf %291, %273 : vector<2x16xf32>
    %301 = arith.mulf %285, %299 : vector<2x16xf32>
    %302 = arith.addf %300, %301 : vector<2x16xf32>
    %303 = math.tanh %302 : vector<2x16xf32>
    %304 = arith.mulf %297, %303 : vector<2x16xf32>
    %305 = tpu.concatenate %272, %304 in 1 : vector<2x16xf32>, vector<2x16xf32> -> vector<2x32xf32>
    %306 = tpu.concatenate %270, %302 in 1 : vector<2x16xf32>, vector<2x16xf32> -> vector<2x32xf32>
    %c3 = arith.constant 3 : index
    %c0_50 = arith.constant 0 : index
    %c0_51 = arith.constant 0 : index
    %307 = vector.load %arg3[%c3, %c0_50, %c0_51] : memref<8x2x32xf32, #tpu.memory_space<vmem>>, vector<1x2x32xf32>
    %308 = vector.shape_cast %307 : vector<1x2x32xf32> to vector<2x32xf32>
    %309 = vector.shape_cast %305 : vector<2x32xf32> to vector<1x2x32xf32>
    tpu.vector_store %arg3[%c3, %c0_50, %c0_51], %309 {strides = array<i32>} : memref<8x2x32xf32, #tpu.memory_space<vmem>>, vector<1x2x32xf32>,
    %cst_52 = arith.constant dense<0.000000e+00> : vector<2x128xf32>
    %310 = tpu.matmul %305, %3, %cst_52 {dimension_numbers = #tpu.dot_dimension_numbers<[1], [0], [0], [1], [0, 0, 1, 1], [], []>} : vector<2x32xf32>, vector<32x128xf32>, vector<2x128xf32> -> vector<2x128xf32>
    %311 = vector.extract_strided_slice %2 {offsets = [8, 0], sizes = [2, 64], strides = [1, 1]} : vector<16x128xf32> to vector<2x64xf32>
    %312 = vector.extract_strided_slice %310 {offsets = [0, 0], sizes = [2, 64], strides = [1, 1]} : vector<2x128xf32> to vector<2x64xf32>
    %313 = arith.addf %311, %312 : vector<2x64xf32>
    %314 = vector.extract_strided_slice %2 {offsets = [6, 64], sizes = [2, 64], strides = [1, 1]} : vector<16x128xf32> to vector<2x64xf32>
    %315 = vector.extract_strided_slice %310 {offsets = [0, 64], sizes = [2, 64], strides = [1, 1]} : vector<2x128xf32> to vector<2x64xf32>
    %316 = arith.addf %314, %315 : vector<2x64xf32>
    %317 = vector.extract_strided_slice %306 {offsets = [0, 0], sizes = [2, 16], strides = [1, 1]} : vector<2x32xf32> to vector<2x16xf32>
    %318 = vector.extract_strided_slice %313 {offsets = [0, 0], sizes = [2, 48], strides = [1, 1]} : vector<2x64xf32> to vector<2x48xf32>
    %319 = arith.negf %318 : vector<2x48xf32>
    %320 = math.exp %319 : vector<2x48xf32>
    %cst_53 = arith.constant 1.000000e+00 : f32
    %321 = vector.broadcast %cst_53 : f32 to vector<2x48xf32>
    %322 = arith.addf %321, %320 : vector<2x48xf32>
    %323 = arith.divf %321, %322 : vector<2x48xf32>
    %324 = vector.extract_strided_slice %323 {offsets = [0, 0], sizes = [2, 16], strides = [1, 1]} : vector<2x48xf32> to vector<2x16xf32>
    %325 = arith.negf %324 : vector<2x16xf32>
    %326 = math.exp %325 : vector<2x16xf32>
    %cst_54 = arith.constant 1.000000e+00 : f32
    %327 = vector.broadcast %cst_54 : f32 to vector<2x16xf32>
    %328 = arith.addf %327, %326 : vector<2x16xf32>
    %329 = arith.divf %327, %328 : vector<2x16xf32>
    %330 = vector.extract_strided_slice %323 {offsets = [0, 16], sizes = [2, 16], strides = [1, 1]} : vector<2x48xf32> to vector<2x16xf32>
    %331 = arith.negf %330 : vector<2x16xf32>
    %332 = math.exp %331 : vector<2x16xf32>
    %cst_55 = arith.constant 1.000000e+00 : f32
    %333 = vector.broadcast %cst_55 : f32 to vector<2x16xf32>
    %334 = arith.addf %333, %332 : vector<2x16xf32>
    %335 = arith.divf %333, %334 : vector<2x16xf32>
    %336 = vector.extract_strided_slice %323 {offsets = [0, 32], sizes = [2, 16], strides = [1, 1]} : vector<2x48xf32> to vector<2x16xf32>
    %337 = arith.negf %336 : vector<2x16xf32>
    %338 = math.exp %337 : vector<2x16xf32>
    %cst_56 = arith.constant 1.000000e+00 : f32
    %339 = vector.broadcast %cst_56 : f32 to vector<2x16xf32>
    %340 = arith.addf %339, %338 : vector<2x16xf32>
    %341 = arith.divf %339, %340 : vector<2x16xf32>
    %342 = vector.extract_strided_slice %313 {offsets = [0, 48], sizes = [2, 16], strides = [1, 1]} : vector<2x64xf32> to vector<2x16xf32>
    %343 = math.tanh %342 : vector<2x16xf32>
    %344 = arith.mulf %335, %317 : vector<2x16xf32>
    %345 = arith.mulf %329, %343 : vector<2x16xf32>
    %346 = arith.addf %344, %345 : vector<2x16xf32>
    %347 = math.tanh %346 : vector<2x16xf32>
    %348 = arith.mulf %341, %347 : vector<2x16xf32>
    %349 = vector.extract_strided_slice %306 {offsets = [0, 16], sizes = [2, 16], strides = [1, 1]} : vector<2x32xf32> to vector<2x16xf32>
    %350 = vector.extract_strided_slice %316 {offsets = [0, 0], sizes = [2, 48], strides = [1, 1]} : vector<2x64xf32> to vector<2x48xf32>
    %351 = arith.negf %350 : vector<2x48xf32>
    %352 = math.exp %351 : vector<2x48xf32>
    %cst_57 = arith.constant 1.000000e+00 : f32
    %353 = vector.broadcast %cst_57 : f32 to vector<2x48xf32>
    %354 = arith.addf %353, %352 : vector<2x48xf32>
    %355 = arith.divf %353, %354 : vector<2x48xf32>
    %356 = vector.extract_strided_slice %355 {offsets = [0, 0], sizes = [2, 16], strides = [1, 1]} : vector<2x48xf32> to vector<2x16xf32>
    %357 = arith.negf %356 : vector<2x16xf32>
    %358 = math.exp %357 : vector<2x16xf32>
    %cst_58 = arith.constant 1.000000e+00 : f32
    %359 = vector.broadcast %cst_58 : f32 to vector<2x16xf32>
    %360 = arith.addf %359, %358 : vector<2x16xf32>
    %361 = arith.divf %359, %360 : vector<2x16xf32>
    %362 = vector.extract_strided_slice %355 {offsets = [0, 16], sizes = [2, 16], strides = [1, 1]} : vector<2x48xf32> to vector<2x16xf32>
    %363 = arith.negf %362 : vector<2x16xf32>
    %364 = math.exp %363 : vector<2x16xf32>
    %cst_59 = arith.constant 1.000000e+00 : f32
    %365 = vector.broadcast %cst_59 : f32 to vector<2x16xf32>
    %366 = arith.addf %365, %364 : vector<2x16xf32>
    %367 = arith.divf %365, %366 : vector<2x16xf32>
    %368 = vector.extract_strided_slice %355 {offsets = [0, 32], sizes = [2, 16], strides = [1, 1]} : vector<2x48xf32> to vector<2x16xf32>
    %369 = arith.negf %368 : vector<2x16xf32>
    %370 = math.exp %369 : vector<2x16xf32>
    %cst_60 = arith.constant 1.000000e+00 : f32
    %371 = vector.broadcast %cst_60 : f32 to vector<2x16xf32>
    %372 = arith.addf %371, %370 : vector<2x16xf32>
    %373 = arith.divf %371, %372 : vector<2x16xf32>
    %374 = vector.extract_strided_slice %316 {offsets = [0, 48], sizes = [2, 16], strides = [1, 1]} : vector<2x64xf32> to vector<2x16xf32>
    %375 = math.tanh %374 : vector<2x16xf32>
    %376 = arith.mulf %367, %349 : vector<2x16xf32>
    %377 = arith.mulf %361, %375 : vector<2x16xf32>
    %378 = arith.addf %376, %377 : vector<2x16xf32>
    %379 = math.tanh %378 : vector<2x16xf32>
    %380 = arith.mulf %373, %379 : vector<2x16xf32>
    %381 = tpu.concatenate %348, %380 in 1 : vector<2x16xf32>, vector<2x16xf32> -> vector<2x32xf32>
    %382 = tpu.concatenate %346, %378 in 1 : vector<2x16xf32>, vector<2x16xf32> -> vector<2x32xf32>
    %c4 = arith.constant 4 : index
    %c0_61 = arith.constant 0 : index
    %c0_62 = arith.constant 0 : index
    %383 = vector.load %arg3[%c4, %c0_61, %c0_62] : memref<8x2x32xf32, #tpu.memory_space<vmem>>, vector<1x2x32xf32>
    %384 = vector.shape_cast %383 : vector<1x2x32xf32> to vector<2x32xf32>
    %385 = vector.shape_cast %381 : vector<2x32xf32> to vector<1x2x32xf32>
    tpu.vector_store %arg3[%c4, %c0_61, %c0_62], %385 {strides = array<i32>} : memref<8x2x32xf32, #tpu.memory_space<vmem>>, vector<1x2x32xf32>,
    %cst_63 = arith.constant dense<0.000000e+00> : vector<2x128xf32>
    %386 = tpu.matmul %381, %3, %cst_63 {dimension_numbers = #tpu.dot_dimension_numbers<[1], [0], [0], [1], [0, 0, 1, 1], [], []>} : vector<2x32xf32>, vector<32x128xf32>, vector<2x128xf32> -> vector<2x128xf32>
    %387 = vector.extract_strided_slice %2 {offsets = [10, 0], sizes = [2, 64], strides = [1, 1]} : vector<16x128xf32> to vector<2x64xf32>
    %388 = vector.extract_strided_slice %386 {offsets = [0, 0], sizes = [2, 64], strides = [1, 1]} : vector<2x128xf32> to vector<2x64xf32>
    %389 = arith.addf %387, %388 : vector<2x64xf32>
    %390 = vector.extract_strided_slice %2 {offsets = [4, 64], sizes = [2, 64], strides = [1, 1]} : vector<16x128xf32> to vector<2x64xf32>
    %391 = vector.extract_strided_slice %386 {offsets = [0, 64], sizes = [2, 64], strides = [1, 1]} : vector<2x128xf32> to vector<2x64xf32>
    %392 = arith.addf %390, %391 : vector<2x64xf32>
    %393 = vector.extract_strided_slice %382 {offsets = [0, 0], sizes = [2, 16], strides = [1, 1]} : vector<2x32xf32> to vector<2x16xf32>
    %394 = vector.extract_strided_slice %389 {offsets = [0, 0], sizes = [2, 48], strides = [1, 1]} : vector<2x64xf32> to vector<2x48xf32>
    %395 = arith.negf %394 : vector<2x48xf32>
    %396 = math.exp %395 : vector<2x48xf32>
    %cst_64 = arith.constant 1.000000e+00 : f32
    %397 = vector.broadcast %cst_64 : f32 to vector<2x48xf32>
    %398 = arith.addf %397, %396 : vector<2x48xf32>
    %399 = arith.divf %397, %398 : vector<2x48xf32>
    %400 = vector.extract_strided_slice %399 {offsets = [0, 0], sizes = [2, 16], strides = [1, 1]} : vector<2x48xf32> to vector<2x16xf32>
    %401 = arith.negf %400 : vector<2x16xf32>
    %402 = math.exp %401 : vector<2x16xf32>
    %cst_65 = arith.constant 1.000000e+00 : f32
    %403 = vector.broadcast %cst_65 : f32 to vector<2x16xf32>
    %404 = arith.addf %403, %402 : vector<2x16xf32>
    %405 = arith.divf %403, %404 : vector<2x16xf32>
    %406 = vector.extract_strided_slice %399 {offsets = [0, 16], sizes = [2, 16], strides = [1, 1]} : vector<2x48xf32> to vector<2x16xf32>
    %407 = arith.negf %406 : vector<2x16xf32>
    %408 = math.exp %407 : vector<2x16xf32>
    %cst_66 = arith.constant 1.000000e+00 : f32
    %409 = vector.broadcast %cst_66 : f32 to vector<2x16xf32>
    %410 = arith.addf %409, %408 : vector<2x16xf32>
    %411 = arith.divf %409, %410 : vector<2x16xf32>
    %412 = vector.extract_strided_slice %399 {offsets = [0, 32], sizes = [2, 16], strides = [1, 1]} : vector<2x48xf32> to vector<2x16xf32>
    %413 = arith.negf %412 : vector<2x16xf32>
    %414 = math.exp %413 : vector<2x16xf32>
    %cst_67 = arith.constant 1.000000e+00 : f32
    %415 = vector.broadcast %cst_67 : f32 to vector<2x16xf32>
    %416 = arith.addf %415, %414 : vector<2x16xf32>
    %417 = arith.divf %415, %416 : vector<2x16xf32>
    %418 = vector.extract_strided_slice %389 {offsets = [0, 48], sizes = [2, 16], strides = [1, 1]} : vector<2x64xf32> to vector<2x16xf32>
    %419 = math.tanh %418 : vector<2x16xf32>
    %420 = arith.mulf %411, %393 : vector<2x16xf32>
    %421 = arith.mulf %405, %419 : vector<2x16xf32>
    %422 = arith.addf %420, %421 : vector<2x16xf32>
    %423 = math.tanh %422 : vector<2x16xf32>
    %424 = arith.mulf %417, %423 : vector<2x16xf32>
    %425 = vector.extract_strided_slice %382 {offsets = [0, 16], sizes = [2, 16], strides = [1, 1]} : vector<2x32xf32> to vector<2x16xf32>
    %426 = vector.extract_strided_slice %392 {offsets = [0, 0], sizes = [2, 48], strides = [1, 1]} : vector<2x64xf32> to vector<2x48xf32>
    %427 = arith.negf %426 : vector<2x48xf32>
    %428 = math.exp %427 : vector<2x48xf32>
    %cst_68 = arith.constant 1.000000e+00 : f32
    %429 = vector.broadcast %cst_68 : f32 to vector<2x48xf32>
    %430 = arith.addf %429, %428 : vector<2x48xf32>
    %431 = arith.divf %429, %430 : vector<2x48xf32>
    %432 = vector.extract_strided_slice %431 {offsets = [0, 0], sizes = [2, 16], strides = [1, 1]} : vector<2x48xf32> to vector<2x16xf32>
    %433 = arith.negf %432 : vector<2x16xf32>
    %434 = math.exp %433 : vector<2x16xf32>
    %cst_69 = arith.constant 1.000000e+00 : f32
    %435 = vector.broadcast %cst_69 : f32 to vector<2x16xf32>
    %436 = arith.addf %435, %434 : vector<2x16xf32>
    %437 = arith.divf %435, %436 : vector<2x16xf32>
    %438 = vector.extract_strided_slice %431 {offsets = [0, 16], sizes = [2, 16], strides = [1, 1]} : vector<2x48xf32> to vector<2x16xf32>
    %439 = arith.negf %438 : vector<2x16xf32>
    %440 = math.exp %439 : vector<2x16xf32>
    %cst_70 = arith.constant 1.000000e+00 : f32
    %441 = vector.broadcast %cst_70 : f32 to vector<2x16xf32>
    %442 = arith.addf %441, %440 : vector<2x16xf32>
    %443 = arith.divf %441, %442 : vector<2x16xf32>
    %444 = vector.extract_strided_slice %431 {offsets = [0, 32], sizes = [2, 16], strides = [1, 1]} : vector<2x48xf32> to vector<2x16xf32>
    %445 = arith.negf %444 : vector<2x16xf32>
    %446 = math.exp %445 : vector<2x16xf32>
    %cst_71 = arith.constant 1.000000e+00 : f32
    %447 = vector.broadcast %cst_71 : f32 to vector<2x16xf32>
    %448 = arith.addf %447, %446 : vector<2x16xf32>
    %449 = arith.divf %447, %448 : vector<2x16xf32>
    %450 = vector.extract_strided_slice %392 {offsets = [0, 48], sizes = [2, 16], strides = [1, 1]} : vector<2x64xf32> to vector<2x16xf32>
    %451 = math.tanh %450 : vector<2x16xf32>
    %452 = arith.mulf %443, %425 : vector<2x16xf32>
    %453 = arith.mulf %437, %451 : vector<2x16xf32>
    %454 = arith.addf %452, %453 : vector<2x16xf32>
    %455 = math.tanh %454 : vector<2x16xf32>
    %456 = arith.mulf %449, %455 : vector<2x16xf32>
    %457 = tpu.concatenate %424, %456 in 1 : vector<2x16xf32>, vector<2x16xf32> -> vector<2x32xf32>
    %458 = tpu.concatenate %422, %454 in 1 : vector<2x16xf32>, vector<2x16xf32> -> vector<2x32xf32>
    %c5 = arith.constant 5 : index
    %c0_72 = arith.constant 0 : index
    %c0_73 = arith.constant 0 : index
    %459 = vector.load %arg3[%c5, %c0_72, %c0_73] : memref<8x2x32xf32, #tpu.memory_space<vmem>>, vector<1x2x32xf32>
    %460 = vector.shape_cast %459 : vector<1x2x32xf32> to vector<2x32xf32>
    %461 = vector.shape_cast %457 : vector<2x32xf32> to vector<1x2x32xf32>
    tpu.vector_store %arg3[%c5, %c0_72, %c0_73], %461 {strides = array<i32>} : memref<8x2x32xf32, #tpu.memory_space<vmem>>, vector<1x2x32xf32>,
    %cst_74 = arith.constant dense<0.000000e+00> : vector<2x128xf32>
    %462 = tpu.matmul %457, %3, %cst_74 {dimension_numbers = #tpu.dot_dimension_numbers<[1], [0], [0], [1], [0, 0, 1, 1], [], []>} : vector<2x32xf32>, vector<32x128xf32>, vector<2x128xf32> -> vector<2x128xf32>
    %463 = vector.extract_strided_slice %2 {offsets = [12, 0], sizes = [2, 64], strides = [1, 1]} : vector<16x128xf32> to vector<2x64xf32>
    %464 = vector.extract_strided_slice %462 {offsets = [0, 0], sizes = [2, 64], strides = [1, 1]} : vector<2x128xf32> to vector<2x64xf32>
    %465 = arith.addf %463, %464 : vector<2x64xf32>
    %466 = vector.extract_strided_slice %2 {offsets = [2, 64], sizes = [2, 64], strides = [1, 1]} : vector<16x128xf32> to vector<2x64xf32>
    %467 = vector.extract_strided_slice %462 {offsets = [0, 64], sizes = [2, 64], strides = [1, 1]} : vector<2x128xf32> to vector<2x64xf32>
    %468 = arith.addf %466, %467 : vector<2x64xf32>
    %469 = vector.extract_strided_slice %458 {offsets = [0, 0], sizes = [2, 16], strides = [1, 1]} : vector<2x32xf32> to vector<2x16xf32>
    %470 = vector.extract_strided_slice %465 {offsets = [0, 0], sizes = [2, 48], strides = [1, 1]} : vector<2x64xf32> to vector<2x48xf32>
    %471 = arith.negf %470 : vector<2x48xf32>
    %472 = math.exp %471 : vector<2x48xf32>
    %cst_75 = arith.constant 1.000000e+00 : f32
    %473 = vector.broadcast %cst_75 : f32 to vector<2x48xf32>
    %474 = arith.addf %473, %472 : vector<2x48xf32>
    %475 = arith.divf %473, %474 : vector<2x48xf32>
    %476 = vector.extract_strided_slice %475 {offsets = [0, 0], sizes = [2, 16], strides = [1, 1]} : vector<2x48xf32> to vector<2x16xf32>
    %477 = arith.negf %476 : vector<2x16xf32>
    %478 = math.exp %477 : vector<2x16xf32>
    %cst_76 = arith.constant 1.000000e+00 : f32
    %479 = vector.broadcast %cst_76 : f32 to vector<2x16xf32>
    %480 = arith.addf %479, %478 : vector<2x16xf32>
    %481 = arith.divf %479, %480 : vector<2x16xf32>
    %482 = vector.extract_strided_slice %475 {offsets = [0, 16], sizes = [2, 16], strides = [1, 1]} : vector<2x48xf32> to vector<2x16xf32>
    %483 = arith.negf %482 : vector<2x16xf32>
    %484 = math.exp %483 : vector<2x16xf32>
    %cst_77 = arith.constant 1.000000e+00 : f32
    %485 = vector.broadcast %cst_77 : f32 to vector<2x16xf32>
    %486 = arith.addf %485, %484 : vector<2x16xf32>
    %487 = arith.divf %485, %486 : vector<2x16xf32>
    %488 = vector.extract_strided_slice %475 {offsets = [0, 32], sizes = [2, 16], strides = [1, 1]} : vector<2x48xf32> to vector<2x16xf32>
    %489 = arith.negf %488 : vector<2x16xf32>
    %490 = math.exp %489 : vector<2x16xf32>
    %cst_78 = arith.constant 1.000000e+00 : f32
    %491 = vector.broadcast %cst_78 : f32 to vector<2x16xf32>
    %492 = arith.addf %491, %490 : vector<2x16xf32>
    %493 = arith.divf %491, %492 : vector<2x16xf32>
    %494 = vector.extract_strided_slice %465 {offsets = [0, 48], sizes = [2, 16], strides = [1, 1]} : vector<2x64xf32> to vector<2x16xf32>
    %495 = math.tanh %494 : vector<2x16xf32>
    %496 = arith.mulf %487, %469 : vector<2x16xf32>
    %497 = arith.mulf %481, %495 : vector<2x16xf32>
    %498 = arith.addf %496, %497 : vector<2x16xf32>
    %499 = math.tanh %498 : vector<2x16xf32>
    %500 = arith.mulf %493, %499 : vector<2x16xf32>
    %501 = vector.extract_strided_slice %458 {offsets = [0, 16], sizes = [2, 16], strides = [1, 1]} : vector<2x32xf32> to vector<2x16xf32>
    %502 = vector.extract_strided_slice %468 {offsets = [0, 0], sizes = [2, 48], strides = [1, 1]} : vector<2x64xf32> to vector<2x48xf32>
    %503 = arith.negf %502 : vector<2x48xf32>
    %504 = math.exp %503 : vector<2x48xf32>
    %cst_79 = arith.constant 1.000000e+00 : f32
    %505 = vector.broadcast %cst_79 : f32 to vector<2x48xf32>
    %506 = arith.addf %505, %504 : vector<2x48xf32>
    %507 = arith.divf %505, %506 : vector<2x48xf32>
    %508 = vector.extract_strided_slice %507 {offsets = [0, 0], sizes = [2, 16], strides = [1, 1]} : vector<2x48xf32> to vector<2x16xf32>
    %509 = arith.negf %508 : vector<2x16xf32>
    %510 = math.exp %509 : vector<2x16xf32>
    %cst_80 = arith.constant 1.000000e+00 : f32
    %511 = vector.broadcast %cst_80 : f32 to vector<2x16xf32>
    %512 = arith.addf %511, %510 : vector<2x16xf32>
    %513 = arith.divf %511, %512 : vector<2x16xf32>
    %514 = vector.extract_strided_slice %507 {offsets = [0, 16], sizes = [2, 16], strides = [1, 1]} : vector<2x48xf32> to vector<2x16xf32>
    %515 = arith.negf %514 : vector<2x16xf32>
    %516 = math.exp %515 : vector<2x16xf32>
    %cst_81 = arith.constant 1.000000e+00 : f32
    %517 = vector.broadcast %cst_81 : f32 to vector<2x16xf32>
    %518 = arith.addf %517, %516 : vector<2x16xf32>
    %519 = arith.divf %517, %518 : vector<2x16xf32>
    %520 = vector.extract_strided_slice %507 {offsets = [0, 32], sizes = [2, 16], strides = [1, 1]} : vector<2x48xf32> to vector<2x16xf32>
    %521 = arith.negf %520 : vector<2x16xf32>
    %522 = math.exp %521 : vector<2x16xf32>
    %cst_82 = arith.constant 1.000000e+00 : f32
    %523 = vector.broadcast %cst_82 : f32 to vector<2x16xf32>
    %524 = arith.addf %523, %522 : vector<2x16xf32>
    %525 = arith.divf %523, %524 : vector<2x16xf32>
    %526 = vector.extract_strided_slice %468 {offsets = [0, 48], sizes = [2, 16], strides = [1, 1]} : vector<2x64xf32> to vector<2x16xf32>
    %527 = math.tanh %526 : vector<2x16xf32>
    %528 = arith.mulf %519, %501 : vector<2x16xf32>
    %529 = arith.mulf %513, %527 : vector<2x16xf32>
    %530 = arith.addf %528, %529 : vector<2x16xf32>
    %531 = math.tanh %530 : vector<2x16xf32>
    %532 = arith.mulf %525, %531 : vector<2x16xf32>
    %533 = tpu.concatenate %500, %532 in 1 : vector<2x16xf32>, vector<2x16xf32> -> vector<2x32xf32>
    %534 = tpu.concatenate %498, %530 in 1 : vector<2x16xf32>, vector<2x16xf32> -> vector<2x32xf32>
    %c6 = arith.constant 6 : index
    %c0_83 = arith.constant 0 : index
    %c0_84 = arith.constant 0 : index
    %535 = vector.load %arg3[%c6, %c0_83, %c0_84] : memref<8x2x32xf32, #tpu.memory_space<vmem>>, vector<1x2x32xf32>
    %536 = vector.shape_cast %535 : vector<1x2x32xf32> to vector<2x32xf32>
    %537 = vector.shape_cast %533 : vector<2x32xf32> to vector<1x2x32xf32>
    tpu.vector_store %arg3[%c6, %c0_83, %c0_84], %537 {strides = array<i32>} : memref<8x2x32xf32, #tpu.memory_space<vmem>>, vector<1x2x32xf32>,
    %cst_85 = arith.constant dense<0.000000e+00> : vector<2x128xf32>
    %538 = tpu.matmul %533, %3, %cst_85 {dimension_numbers = #tpu.dot_dimension_numbers<[1], [0], [0], [1], [0, 0, 1, 1], [], []>} : vector<2x32xf32>, vector<32x128xf32>, vector<2x128xf32> -> vector<2x128xf32>
    %539 = vector.extract_strided_slice %2 {offsets = [14, 0], sizes = [2, 64], strides = [1, 1]} : vector<16x128xf32> to vector<2x64xf32>
    %540 = vector.extract_strided_slice %538 {offsets = [0, 0], sizes = [2, 64], strides = [1, 1]} : vector<2x128xf32> to vector<2x64xf32>
    %541 = arith.addf %539, %540 : vector<2x64xf32>
    %542 = vector.extract_strided_slice %2 {offsets = [0, 64], sizes = [2, 64], strides = [1, 1]} : vector<16x128xf32> to vector<2x64xf32>
    %543 = vector.extract_strided_slice %538 {offsets = [0, 64], sizes = [2, 64], strides = [1, 1]} : vector<2x128xf32> to vector<2x64xf32>
    %544 = arith.addf %542, %543 : vector<2x64xf32>
    %545 = vector.extract_strided_slice %534 {offsets = [0, 0], sizes = [2, 16], strides = [1, 1]} : vector<2x32xf32> to vector<2x16xf32>
    %546 = vector.extract_strided_slice %541 {offsets = [0, 0], sizes = [2, 48], strides = [1, 1]} : vector<2x64xf32> to vector<2x48xf32>
    %547 = arith.negf %546 : vector<2x48xf32>
    %548 = math.exp %547 : vector<2x48xf32>
    %cst_86 = arith.constant 1.000000e+00 : f32
    %549 = vector.broadcast %cst_86 : f32 to vector<2x48xf32>
    %550 = arith.addf %549, %548 : vector<2x48xf32>
    %551 = arith.divf %549, %550 : vector<2x48xf32>
    %552 = vector.extract_strided_slice %551 {offsets = [0, 0], sizes = [2, 16], strides = [1, 1]} : vector<2x48xf32> to vector<2x16xf32>
    %553 = arith.negf %552 : vector<2x16xf32>
    %554 = math.exp %553 : vector<2x16xf32>
    %cst_87 = arith.constant 1.000000e+00 : f32
    %555 = vector.broadcast %cst_87 : f32 to vector<2x16xf32>
    %556 = arith.addf %555, %554 : vector<2x16xf32>
    %557 = arith.divf %555, %556 : vector<2x16xf32>
    %558 = vector.extract_strided_slice %551 {offsets = [0, 16], sizes = [2, 16], strides = [1, 1]} : vector<2x48xf32> to vector<2x16xf32>
    %559 = arith.negf %558 : vector<2x16xf32>
    %560 = math.exp %559 : vector<2x16xf32>
    %cst_88 = arith.constant 1.000000e+00 : f32
    %561 = vector.broadcast %cst_88 : f32 to vector<2x16xf32>
    %562 = arith.addf %561, %560 : vector<2x16xf32>
    %563 = arith.divf %561, %562 : vector<2x16xf32>
    %564 = vector.extract_strided_slice %551 {offsets = [0, 32], sizes = [2, 16], strides = [1, 1]} : vector<2x48xf32> to vector<2x16xf32>
    %565 = arith.negf %564 : vector<2x16xf32>
    %566 = math.exp %565 : vector<2x16xf32>
    %cst_89 = arith.constant 1.000000e+00 : f32
    %567 = vector.broadcast %cst_89 : f32 to vector<2x16xf32>
    %568 = arith.addf %567, %566 : vector<2x16xf32>
    %569 = arith.divf %567, %568 : vector<2x16xf32>
    %570 = vector.extract_strided_slice %541 {offsets = [0, 48], sizes = [2, 16], strides = [1, 1]} : vector<2x64xf32> to vector<2x16xf32>
    %571 = math.tanh %570 : vector<2x16xf32>
    %572 = arith.mulf %563, %545 : vector<2x16xf32>
    %573 = arith.mulf %557, %571 : vector<2x16xf32>
    %574 = arith.addf %572, %573 : vector<2x16xf32>
    %575 = math.tanh %574 : vector<2x16xf32>
    %576 = arith.mulf %569, %575 : vector<2x16xf32>
    %577 = vector.extract_strided_slice %534 {offsets = [0, 16], sizes = [2, 16], strides = [1, 1]} : vector<2x32xf32> to vector<2x16xf32>
    %578 = vector.extract_strided_slice %544 {offsets = [0, 0], sizes = [2, 48], strides = [1, 1]} : vector<2x64xf32> to vector<2x48xf32>
    %579 = arith.negf %578 : vector<2x48xf32>
    %580 = math.exp %579 : vector<2x48xf32>
    %cst_90 = arith.constant 1.000000e+00 : f32
    %581 = vector.broadcast %cst_90 : f32 to vector<2x48xf32>
    %582 = arith.addf %581, %580 : vector<2x48xf32>
    %583 = arith.divf %581, %582 : vector<2x48xf32>
    %584 = vector.extract_strided_slice %583 {offsets = [0, 0], sizes = [2, 16], strides = [1, 1]} : vector<2x48xf32> to vector<2x16xf32>
    %585 = arith.negf %584 : vector<2x16xf32>
    %586 = math.exp %585 : vector<2x16xf32>
    %cst_91 = arith.constant 1.000000e+00 : f32
    %587 = vector.broadcast %cst_91 : f32 to vector<2x16xf32>
    %588 = arith.addf %587, %586 : vector<2x16xf32>
    %589 = arith.divf %587, %588 : vector<2x16xf32>
    %590 = vector.extract_strided_slice %583 {offsets = [0, 16], sizes = [2, 16], strides = [1, 1]} : vector<2x48xf32> to vector<2x16xf32>
    %591 = arith.negf %590 : vector<2x16xf32>
    %592 = math.exp %591 : vector<2x16xf32>
    %cst_92 = arith.constant 1.000000e+00 : f32
    %593 = vector.broadcast %cst_92 : f32 to vector<2x16xf32>
    %594 = arith.addf %593, %592 : vector<2x16xf32>
    %595 = arith.divf %593, %594 : vector<2x16xf32>
    %596 = vector.extract_strided_slice %583 {offsets = [0, 32], sizes = [2, 16], strides = [1, 1]} : vector<2x48xf32> to vector<2x16xf32>
    %597 = arith.negf %596 : vector<2x16xf32>
    %598 = math.exp %597 : vector<2x16xf32>
    %cst_93 = arith.constant 1.000000e+00 : f32
    %599 = vector.broadcast %cst_93 : f32 to vector<2x16xf32>
    %600 = arith.addf %599, %598 : vector<2x16xf32>
    %601 = arith.divf %599, %600 : vector<2x16xf32>
    %602 = vector.extract_strided_slice %544 {offsets = [0, 48], sizes = [2, 16], strides = [1, 1]} : vector<2x64xf32> to vector<2x16xf32>
    %603 = math.tanh %602 : vector<2x16xf32>
    %604 = arith.mulf %595, %577 : vector<2x16xf32>
    %605 = arith.mulf %589, %603 : vector<2x16xf32>
    %606 = arith.addf %604, %605 : vector<2x16xf32>
    %607 = math.tanh %606 : vector<2x16xf32>
    %608 = arith.mulf %601, %607 : vector<2x16xf32>
    %609 = tpu.concatenate %576, %608 in 1 : vector<2x16xf32>, vector<2x16xf32> -> vector<2x32xf32>
    %610 = tpu.concatenate %574, %606 in 1 : vector<2x16xf32>, vector<2x16xf32> -> vector<2x32xf32>
    %c7 = arith.constant 7 : index
    %c0_94 = arith.constant 0 : index
    %c0_95 = arith.constant 0 : index
    %611 = vector.load %arg3[%c7, %c0_94, %c0_95] : memref<8x2x32xf32, #tpu.memory_space<vmem>>, vector<1x2x32xf32>
    %612 = vector.shape_cast %611 : vector<1x2x32xf32> to vector<2x32xf32>
    %613 = vector.shape_cast %609 : vector<2x32xf32> to vector<1x2x32xf32>
    tpu.vector_store %arg3[%c7, %c0_94, %c0_95], %613 {strides = array<i32>} : memref<8x2x32xf32, #tpu.memory_space<vmem>>, vector<1x2x32xf32>,
    %c0_96 = arith.constant 0 : index
    %c0_97 = arith.constant 0 : index
    %614 = vector.load %arg4[%c0_96, %c0_97] : memref<2x32xf32, #tpu.memory_space<vmem>>, vector<2x32xf32>
    tpu.vector_store %arg4[%c0_96, %c0_97], %609 {strides = array<i32>} : memref<2x32xf32, #tpu.memory_space<vmem>>, vector<2x32xf32>,
    %c0_98 = arith.constant 0 : index
    %c0_99 = arith.constant 0 : index
    %615 = vector.load %arg5[%c0_98, %c0_99] : memref<2x32xf32, #tpu.memory_space<vmem>>, vector<2x32xf32>
    tpu.vector_store %arg5[%c0_98, %c0_99], %610 {strides = array<i32>} : memref<2x32xf32, #tpu.memory_space<vmem>>, vector<2x32xf32>,
    return
  }
}

</mosaic_0001>

<bundles_post_ra>
// kernel: lstm_forward.1
= control target key start
LH: loop header
LB: loop body
LE: loop exit
PB: predicated region body
PF: predicated region fallthrough
CT: control target
= control target key end

     0   :  { %11 = vsyncpa [#allocation3], 0  ;;  %vm23_vm0 = vcmask 130048   ;;  %v1990_v3 = vmov 0.0|0.0   ;;  %vm1991_vm1 = vmmov 0   ;;  %v1992_v10 = vmov 0.0   ;;  %s2305_s0 = inlined_call_operand.vmem [shape: f32[16,16], index: 0, kind: input, shape index: {}]   ;;  %s2306_s1 = inlined_call_operand.vmem [shape: f32[16,128], index: 1, kind: input, shape index: {}]   ;;  %s2307_s2 = inlined_call_operand.vmem [shape: f32[32,128], index: 2, kind: input, shape index: {}]   ;;  %s2308_s3 = inlined_call_operand.vmem [shape: f32[8,2,32], index: 3, kind: output, shape index: {0}]   ;;  %s2309_s4 = inlined_call_operand.hbm [shape: f32[2,32], index: 4, kind: output, shape index: {1}]   ;;  %s2310_s5 = inlined_call_operand.hbm [shape: f32[2,32], index: 5, kind: output, shape index: {2}]  }
   0x1   :  { %v105_v0 = vld [vmem:[%s2307_s2] sm:$0xff]  ;;  %v106_v1 = vld [vmem:[%s2307_s2 + $0x8] sm:$0xff]  ;;  %1691 = vmatprep.subr.bf16.mxu1 %v1990_v3  ;;  %v107_v6 = vld [vmem:[%s2307_s2 + $0x10] sm:$0xff]  ;;  %1607 = vmatprep.mubr.msk.f32.mxu1 %vm1991_vm1, %v1992_v10 }
   0x2   :  { %v21_v2 = vld [vmem:[%s2306_s1] sm:$0xff]  ;;  %v2041_v4 = vpack.c.bf16 %v106_v1, %v105_v0  ;;  %v22_v5 = vld [vmem:[%s2306_s1 + $0x8] sm:$0xff]  ;;  %v108_v7 = vld [vmem:[%s2307_s2 + $0x18] sm:$0xff] }
   0x3   :  { %v1687_v8 = vpack.c.bf16 %v22_v5, %v21_v2  ;;  %v19_v9 = vld [vmem:[%s2305_s0] sm:$0xff] }
   0x4   :  { %12 = vsyncpa [#allocation5], 0  ;;  %1693 = vmatpush3.bf16.msra.mxu1 %v2041_v4  ;;  %v2058_v11 = vpack.c.bf16 %v108_v7, %v107_v6  ;;  %1596 = vmatprep.mubr.msk.f32.mxu0 %vm23_vm0, %v19_v9  ;;  %v20_v12 = vld [vmem:[%s2305_s0 + $0x8] sm:$0xff]  ;;  %s1993_s0 = smov 80   ;;  %s1994_s7 = smov 16   ;;  %vm268_vm2 = vcmask 254976  }
   0x5   :  { %1688 = vmatprep.subr.bf16.mxu0 %v1687_v8  ;;  %1694 = vmatprep.subr.bf16.mxu1 %v1990_v3  ;;  %s1995_s8 = smov 48   ;;  %s1996_s9 = smov 96   ;;  %vm109_vm3 = vcmask 261120   ;;  %vm440_vm4 = vcmask 257026   ;;  %vm612_vm5 = vcmask 259076   ;;  %vm783_vm6 = vcmask 261126  }
   0x6   :  { %1690 = vmatpush3.bf16.msra.mxu0 %v1687_v8  ;;  %s1997_s10 = smov 64   ;;  %s1998_s11 = smov 112  }
   0x7   :  { %1697 = vmatprep.subr.bf16.mxu0 %v1990_v3  ;;  %s1999_s26 = smov [#allocation2]   ;;  %s2000_s28 = smov [#allocation4]  }
   0x8   :  { %1696 = vmatpush3.bf16.msra.mxu1 %v2058_v11  ;;  %s1476_s27 = sshll.u32 %s1999_s26, 4  ;;  %s1486_s29 = sshll.u32 %s2000_s28, 4  ;;  %s1477_s27 = int_to_ptr.vmem [resolvable:$true] %s1476_s27  ;;  %s1487_s29 = int_to_ptr.vmem [resolvable:$true] %s1486_s29 }
   0x9   :  { %1597 = vmatmul.mubr.msk.f32.vlgmr.msra.gmra.mrb[0].mxu0 %vm23_vm0, %v20_v12  ;;  %1703 = vmatprep.subr.bf16.mxu1 %v1990_v3  ;;  %s1942_s1 = scalar_lea.vmem %s1477_s27, 32  ;;  %p1947_p1 = scmp.lt.s32.totalorder %s1477_s27, %s1477_s27 }
   0xa   :  { %1699 = vmatpush3.bf16.msra.mxu0 %v2041_v4  ;;  %1618 = vmatprep.mubr.msk.f32.mxu0 %vm1991_vm1, %v1992_v10  ;;  %p1943_p0 = scmp.ne.s32.totalorder %s1477_s27, %s1942_s1  ;;  %p1948_p2 = scmp.lt.s32.totalorder %s1942_s1, %s1942_s1 }
   0xb   :  { %1608 = vmatmul.mubr.f32.vlgmr.msra.gmra.mrb[0].mxu1 %v1992_v10  ;;  %1700 = vmatprep.subr.bf16.mxu0 %v1990_v3 }
   0xc   :  { %1705 = vmatpush3.bf16.msra.mxu1 %v2041_v4  ;;  %1629 = vmatprep.mubr.msk.f32.mxu1 %vm1991_vm1, %v1992_v10  ;;  %p1949_p3 = por %p1948_p2, %p1947_p1 }
   0xd   :  { %1706 = vmatprep.subr.bf16.mxu1 %v1990_v3 }
   0xe   :  { %1702 = vmatpush3.bf16.msra.mxu0 %v2058_v11  ;;  %p1950_p4 = pnand %p1949_p3, %p1943_p0 }
   0xf   :  { %1709 = vmatprep.subr.bf16.mxu0 %v1990_v3 }
  0x10   :  { %1708 = vmatpush3.bf16.msra.mxu1 %v2058_v11 }
  0x11   :  { %1715 = vmatprep.subr.bf16.mxu1 %v1990_v3 }
  0xdc   :  { %v2082_v13 = vpop.f32.mrb[0].mxu0 }
  0xdd   :  { %v2084_v14 = vpop.f32.mrb[1].mxu0 }
  0xde   :  { %v179_v15 = vpop.f32.mrb[0].mxu1 }
  0xdf   :  { %v183_v16 = vadd.f32 %v179_v15, %v2084_v14  ;;  %v185_v17 = vrot.slane %v179_v15, 2  ;;  %v1609_v18 = vpop.f32.mrb[1].mxu1 }
  0xe1   :  { %v187_v19 = vadd.f32 %v2082_v13, %v185_v17  ;;  %v1502_v23 = vmul.f32 -1.442695, %v183_v16 }
  0xe3   :  { %1750 = vtanh.f32 %v187_v19  ;;  %v1504_v22 = vmul.f32 -1.442695, %v187_v19 }
  0xe4   :  { %1752 = vtanh.f32 %v183_v16 }
  0xe5   :  { %1754 = vpow2.f32 %v1504_v22 }
  0xe6   :  { %1756 = vpow2.f32 %v1502_v23 }
  0xed   :  { %v1751_v20 = vpop.eup %1750 }
  0xee   :  { %233 = vrot.lane.b32.xlu0 %v1751_v20, %s1993_s0  ;;  %v1753_v21 = vpop.eup %1752 }
  0xef   :  { %v1755_v24 = vpop.eup %1754 }
  0xf0   :  { %v221_v25 = vadd.f32 1.0, %v1755_v24  ;;  %v1757_v26 = vpop.eup %1756 }
  0xf1   :  { %v191_v27 = vadd.f32 1.0, %v1757_v26 }
  0xf2   :  { %203 = vrot.lane.b32.xlu0 %v1753_v21, %s1993_s0  ;;  %1758 = vrcp.f32 %v221_v25 }
  0xf3   :  { %1760 = vrcp.f32 %v191_v27 }
  0xfc   :  { %v1759_v28 = vpop.eup %1758 }
  0xfd   :  { %v1505_v29 = vmul.f32 -1.442695, %v1759_v28  ;;  %v1761_v30 = vpop.eup %1760 }
  0xfe   :  { %v1503_v31 = vmul.f32 -1.442695, %v1761_v30 }
  0xff   :  { %1762 = vpow2.f32 %v1505_v29 }
 0x100   :  { %1764 = vpow2.f32 %v1503_v31 }
 0x109   :  { %v1763_v32 = vpop.eup %1762 }
 0x10a   :  { %v227_v33 = vadd.f32 1.0, %v1763_v32  ;;  %v1765_v34 = vpop.eup %1764 }
 0x10b   :  { %v197_v35 = vadd.f32 1.0, %v1765_v34 }
 0x10c   :  { %1766 = vrcp.f32 %v227_v33 }
 0x10d   :  { %1768 = vrcp.f32 %v197_v35 }
 0x116   :  { %v1767_v36 = vpop.eup %1766 }
 0x117   :  { %v1769_v39 = vpop.eup %1768  ;;  %v231_v42 = vmul.f32 0.0, %v1767_v36 }
 0x118   :  { %v201_v45 = vmul.f32 0.0, %v1769_v39 }
 0x160   :  { %v234_v37 = vpop.permute.xlu0 %233 }
 0x161   :  { %v236_v38 = vmul.f32 %v1767_v36, %v234_v37 }
 0x163   :  { %238 = vrot.lane.b32.xlu1 %v236_v38, %s1994_s7 }
 0x164   :  { %v204_v40 = vpop.permute.xlu0 %203 }
 0x165   :  { %v206_v41 = vmul.f32 %v1769_v39, %v204_v40 }
 0x167   :  { %208 = vrot.lane.b32.xlu1 %v206_v41, %s1994_s7 }
 0x1d5   :  { %v239_v43 = vpop.permute.xlu1 %238 }
 0x1d6   :  { %v241_v44 = vadd.f32 %v239_v43, %v231_v42 }
 0x1d8   :  { %1770 = vtanh.f32 %v241_v44  ;;  %v263_v55 = vrot.slane %v241_v44, 6 }
 0x1d9   :  { %v209_v46 = vpop.permute.xlu1 %208 }
 0x1da   :  { %v211_v47 = vadd.f32 %v209_v46, %v201_v45 }
 0x1dc   :  { %1772 = vtanh.f32 %v211_v47 }
 0x1e2   :  { %v1771_v48 = vpop.eup %1770 }
 0x1e3   :  { %244 = vrot.lane.b32.xlu0 %v1771_v48, %s1994_s7 }
 0x1e6   :  { %v1773_v49 = vpop.eup %1772 }
 0x1e7   :  { %214 = vrot.lane.b32.xlu1 %v1773_v49, %s1994_s7 }
 0x255   :  { %v245_v50 = vpop.permute.xlu0 %244 }
 0x256   :  { %v247_v51 = vmul.f32 %v1767_v36, %v245_v50 }
 0x258   :  { %v253_v52 = vrot.slane %v247_v51, 6 }
 0x259   :  { %v215_v53 = vpop.permute.xlu1 %214 }
 0x25a   :  { %v217_v54 = vmul.f32 %v1769_v39, %v215_v53  ;;  %254 = vrot.lane.b32.xlu1 %v253_v52, %s1995_s8 }
 0x25c   :  { %249 = vrot.lane.b32.xlu0 %v217_v54, %s1996_s9 }
 0x25e   :  { %264 = vrot.lane.b32.xlu1 %v263_v55, %s1997_s10 }
 0x260   :  { %259 = vrot.lane.b32.xlu0 %v211_v47, %s1998_s11 }
 0x2cc   :  { %v255_v56 = vpop.permute.xlu1 %254 }
 0x2ce   :  { %v250_v57 = vpop.permute.xlu0 %249 }
 0x2cf   :  { %v257_v58 = vsel %vm23_vm0, %v250_v57, %v255_v56 }
 0x2d0   :  { %269 = vst.msk [vmem:[%s2308_s3] sm:$0x3] %vm268_vm2, %v257_v58  ;;  %1619 = vmatmul.mubr.msk.f32.vlgmr.msra.gmra.mrb[2].mxu0 %vm109_vm3, %v257_v58  ;;  %v265_v2 = vpop.permute.xlu1 %264 }
 0x2d1   :  { %1711 = vmatpush3.bf16.msra.mxu0 %v2041_v4  ;;  %1640 = vmatprep.mubr.msk.f32.mxu0 %vm1991_vm1, %v1992_v10 }
 0x2d2   :  { %1712 = vmatprep.subr.bf16.mxu0 %v1990_v3  ;;  %v260_v1 = vpop.permute.xlu0 %259 }
 0x2d3   :  { %v267_v6 = vsel %vm23_vm0, %v260_v1, %v265_v2 }
 0x2d4   :  { %v364_v8 = vrot.slane %v267_v6, 6  ;;  %v398_v9 = vrot.slane %v267_v6, 4 }
 0x2d5   :  { %1714 = vmatpush3.bf16.msra.mxu0 %v2058_v11 }
 0x2d6   :  { %1721 = vmatprep.subr.bf16.mxu0 %v1990_v3 }
 0x3a3   :  { %v339_v59 = vpop.f32.mrb[2].mxu0 }
 0x3a4   :  { %v344_v60 = vrot.slane %v339_v59, 6  ;;  %v347_v61 = vrot.slane %v339_v59, 4  ;;  %v1620_v62 = vpop.f32.mrb[3].mxu0 }
 0x3a6   :  { %v346_v63 = vadd.f32 %v344_v60, %v2084_v14  ;;  %v349_v0 = vadd.f32 %v2082_v13, %v347_v61 }
 0x3a8   :  { %1774 = vtanh.f32 %v346_v63  ;;  %v1507_v12 = vmul.f32 -1.442695, %v346_v63  ;;  %v1509_v15 = vmul.f32 -1.442695, %v349_v0 }
 0x3a9   :  { %1776 = vtanh.f32 %v349_v0 }
 0x3aa   :  { %1778 = vpow2.f32 %v1507_v12 }
 0x3ab   :  { %1780 = vpow2.f32 %v1509_v15 }
 0x3b2   :  { %v1775_v5 = vpop.eup %1774 }
 0x3b3   :  { %v1777_v7 = vpop.eup %1776  ;;  %370 = vrot.lane.b32.xlu1 %v1775_v5, %s1993_s0 }
 0x3b4   :  { %404 = vrot.lane.b32.xlu0 %v1777_v7, %s1993_s0  ;;  %v1779_v16 = vpop.eup %1778 }
 0x3b5   :  { %v1781_v17 = vpop.eup %1780  ;;  %v353_v18 = vadd.f32 1.0, %v1779_v16 }
 0x3b6   :  { %v388_v19 = vadd.f32 1.0, %v1781_v17 }
 0x3b7   :  { %365 = vrot.lane.b32.xlu1 %v364_v8, %s1994_s7  ;;  %1782 = vrcp.f32 %v353_v18 }
 0x3b8   :  { %399 = vrot.lane.b32.xlu0 %v398_v9, %s1997_s10  ;;  %1784 = vrcp.f32 %v388_v19 }
 0x3c1   :  { %v1783_v20 = vpop.eup %1782 }
 0x3c2   :  { %v1785_v21 = vpop.eup %1784  ;;  %v1508_v22 = vmul.f32 -1.442695, %v1783_v20 }
 0x3c3   :  { %v1510_v23 = vmul.f32 -1.442695, %v1785_v21 }
 0x3c4   :  { %1786 = vpow2.f32 %v1508_v22 }
 0x3c5   :  { %1788 = vpow2.f32 %v1510_v23 }
 0x3ce   :  { %v1787_v24 = vpop.eup %1786 }
 0x3cf   :  { %v1789_v25 = vpop.eup %1788  ;;  %v359_v26 = vadd.f32 1.0, %v1787_v24 }
 0x3d0   :  { %v394_v27 = vadd.f32 1.0, %v1789_v25 }
 0x3d1   :  { %1790 = vrcp.f32 %v359_v26 }
 0x3d2   :  { %1792 = vrcp.f32 %v394_v27 }
 0x3db   :  { %v1791_v28 = vpop.eup %1790 }
 0x3dc   :  { %v1793_v30 = vpop.eup %1792 }
 0x425   :  { %v371_v29 = vpop.permute.xlu1 %370 }
 0x426   :  { %v405_v31 = vpop.permute.xlu0 %404  ;;  %v373_v32 = vmul.f32 %v1791_v28, %v371_v29 }
 0x427   :  { %v407_v33 = vmul.f32 %v1793_v30, %v405_v31 }
 0x428   :  { %375 = vrot.lane.b32.xlu1 %v373_v32, %s1994_s7 }
 0x429   :  { %409 = vrot.lane.b32.xlu0 %v407_v33, %s1994_s7  ;;  %v366_v34 = vpop.permute.xlu1 %365 }
 0x42a   :  { %v400_v35 = vpop.permute.xlu0 %399  ;;  %v368_v36 = vmul.f32 %v1791_v28, %v366_v34 }
 0x42b   :  { %v402_v37 = vmul.f32 %v1793_v30, %v400_v35 }
 0x49a   :  { %v376_v38 = vpop.permute.xlu1 %375 }
 0x49b   :  { %v410_v39 = vpop.permute.xlu0 %409  ;;  %v378_v40 = vadd.f32 %v376_v38, %v368_v36 }
 0x49c   :  { %v412_v41 = vadd.f32 %v410_v39, %v402_v37 }
 0x49d   :  { %1794 = vtanh.f32 %v378_v40 }
 0x49e   :  { %1796 = vtanh.f32 %v412_v41  ;;  %v434_v49 = vrot.slane %v412_v41, 2 }
 0x4a7   :  { %v1795_v42 = vpop.eup %1794 }
 0x4a8   :  { %v1797_v43 = vpop.eup %1796  ;;  %381 = vrot.lane.b32.xlu1 %v1795_v42, %s1994_s7 }
 0x4a9   :  { %415 = vrot.lane.b32.xlu0 %v1797_v43, %s1994_s7 }
 0x51a   :  { %v382_v44 = vpop.permute.xlu1 %381 }
 0x51b   :  { %v416_v45 = vpop.permute.xlu0 %415  ;;  %v384_v46 = vmul.f32 %v1791_v28, %v382_v44 }
 0x51c   :  { %v418_v47 = vmul.f32 %v1793_v30, %v416_v45 }
 0x51d   :  { %420 = vrot.lane.b32.xlu0 %v384_v46, %s1996_s9 }
 0x51e   :  { %v424_v48 = vrot.slane %v418_v47, 2 }
 0x520   :  { %425 = vrot.lane.b32.xlu1 %v424_v48, %s1995_s8 }
 0x521   :  { %430 = vrot.lane.b32.xlu0 %v378_v40, %s1998_s11 }
 0x524   :  { %435 = vrot.lane.b32.xlu1 %v434_v49, %s1997_s10 }
 0x58f   :  { %v421_v50 = vpop.permute.xlu0 %420 }
 0x592   :  { %v426_v51 = vpop.permute.xlu1 %425 }
 0x593   :  { %v428_v52 = vsel %vm23_vm0, %v421_v50, %v426_v51  ;;  %v431_v61 = vpop.permute.xlu0 %430 }
 0x594   :  { %1511 = vst.msk [vmem:[%s2308_s3] sm:$0xc] %vm440_vm4, %v428_v52  ;;  %v443_v53 = vrot.slane %v428_v52, 2 }
 0x596   :  { %1630 = vmatmul.mubr.msk.f32.vlgmr.msra.gmra.mrb[2].mxu1 %vm109_vm3, %v443_v53  ;;  %v436_v60 = vpop.permute.xlu1 %435 }
 0x597   :  { %1717 = vmatpush3.bf16.msra.mxu1 %v2041_v4  ;;  %1651 = vmatprep.mubr.msk.f32.mxu1 %vm1991_vm1, %v1992_v10  ;;  %v438_v63 = vsel %vm23_vm0, %v431_v61, %v436_v60 }
 0x598   :  { %1718 = vmatprep.subr.bf16.mxu1 %v1990_v3  ;;  %v537_v1 = vrot.slane %v438_v63, 6 }
 0x59b   :  { %1720 = vmatpush3.bf16.msra.mxu1 %v2058_v11 }
 0x59c   :  { %1727 = vmatprep.subr.bf16.mxu1 %v1990_v3 }
 0x669   :  { %v512_v54 = vpop.f32.mrb[2].mxu1 }
 0x66a   :  { %v517_v55 = vrot.slane %v512_v54, 4  ;;  %v520_v56 = vrot.slane %v512_v54, 6  ;;  %v1631_v57 = vpop.f32.mrb[3].mxu1 }
 0x66c   :  { %v519_v58 = vadd.f32 %v517_v55, %v2084_v14  ;;  %v522_v59 = vadd.f32 %v2082_v13, %v520_v56 }
 0x66e   :  { %1798 = vtanh.f32 %v519_v58  ;;  %v1513_v2 = vmul.f32 -1.442695, %v519_v58  ;;  %v1515_v5 = vmul.f32 -1.442695, %v522_v59 }
 0x66f   :  { %1800 = vtanh.f32 %v522_v59 }
 0x670   :  { %1802 = vpow2.f32 %v1513_v2 }
 0x671   :  { %1804 = vpow2.f32 %v1515_v5 }
 0x678   :  { %v1799_v62 = vpop.eup %1798 }
 0x679   :  { %v1801_v0 = vpop.eup %1800  ;;  %543 = vrot.lane.b32.xlu1 %v1799_v62, %s1993_s0 }
 0x67a   :  { %576 = vrot.lane.b32.xlu0 %v1801_v0, %s1993_s0  ;;  %v1803_v6 = vpop.eup %1802 }
 0x67b   :  { %v1805_v7 = vpop.eup %1804  ;;  %v526_v8 = vadd.f32 1.0, %v1803_v6 }
 0x67c   :  { %v561_v9 = vadd.f32 1.0, %v1805_v7 }
 0x67d   :  { %538 = vrot.lane.b32.xlu1 %v537_v1, %s1994_s7  ;;  %1806 = vrcp.f32 %v526_v8 }
 0x67e   :  { %571 = vrot.lane.b32.xlu0 %v438_v63, %s1997_s10  ;;  %1808 = vrcp.f32 %v561_v9 }
 0x687   :  { %v1807_v12 = vpop.eup %1806 }
 0x688   :  { %v1809_v15 = vpop.eup %1808  ;;  %v1514_v16 = vmul.f32 -1.442695, %v1807_v12 }
 0x689   :  { %v1516_v17 = vmul.f32 -1.442695, %v1809_v15 }
 0x68a   :  { %1810 = vpow2.f32 %v1514_v16 }
 0x68b   :  { %1812 = vpow2.f32 %v1516_v17 }
 0x694   :  { %v1811_v18 = vpop.eup %1810 }
 0x695   :  { %v1813_v19 = vpop.eup %1812  ;;  %v532_v20 = vadd.f32 1.0, %v1811_v18 }
 0x696   :  { %v567_v21 = vadd.f32 1.0, %v1813_v19 }
 0x697   :  { %1814 = vrcp.f32 %v532_v20 }
 0x698   :  { %1816 = vrcp.f32 %v567_v21 }
 0x6a1   :  { %v1815_v22 = vpop.eup %1814 }
 0x6a2   :  { %v1817_v24 = vpop.eup %1816 }
 0x6eb   :  { %v544_v23 = vpop.permute.xlu1 %543 }
 0x6ec   :  { %v577_v25 = vpop.permute.xlu0 %576  ;;  %v546_v26 = vmul.f32 %v1815_v22, %v544_v23 }
 0x6ed   :  { %v579_v27 = vmul.f32 %v1817_v24, %v577_v25 }
 0x6ee   :  { %548 = vrot.lane.b32.xlu1 %v546_v26, %s1994_s7 }
 0x6ef   :  { %581 = vrot.lane.b32.xlu0 %v579_v27, %s1994_s7  ;;  %v539_v28 = vpop.permute.xlu1 %538 }
 0x6f0   :  { %v572_v29 = vpop.permute.xlu0 %571  ;;  %v541_v30 = vmul.f32 %v1815_v22, %v539_v28 }
 0x6f1   :  { %v574_v31 = vmul.f32 %v1817_v24, %v572_v29 }
 0x760   :  { %v549_v32 = vpop.permute.xlu1 %548 }
 0x761   :  { %v582_v33 = vpop.permute.xlu0 %581  ;;  %v551_v34 = vadd.f32 %v549_v32, %v541_v30 }
 0x762   :  { %v584_v35 = vadd.f32 %v582_v33, %v574_v31 }
 0x763   :  { %1818 = vtanh.f32 %v551_v34 }
 0x764   :  { %1820 = vtanh.f32 %v584_v35  ;;  %v606_v43 = vrot.slane %v584_v35, 6 }
 0x76d   :  { %v1819_v36 = vpop.eup %1818 }
 0x76e   :  { %v1821_v37 = vpop.eup %1820  ;;  %554 = vrot.lane.b32.xlu1 %v1819_v36, %s1994_s7 }
 0x76f   :  { %587 = vrot.lane.b32.xlu0 %v1821_v37, %s1994_s7 }
 0x7e0   :  { %v555_v38 = vpop.permute.xlu1 %554 }
 0x7e1   :  { %v588_v39 = vpop.permute.xlu0 %587  ;;  %v557_v40 = vmul.f32 %v1815_v22, %v555_v38 }
 0x7e2   :  { %v590_v41 = vmul.f32 %v1817_v24, %v588_v39 }
 0x7e3   :  { %592 = vrot.lane.b32.xlu0 %v557_v40, %s1996_s9 }
 0x7e4   :  { %v596_v42 = vrot.slane %v590_v41, 6 }
 0x7e6   :  { %597 = vrot.lane.b32.xlu1 %v596_v42, %s1995_s8 }
 0x7e7   :  { %602 = vrot.lane.b32.xlu0 %v551_v34, %s1998_s11 }
 0x7ea   :  { %607 = vrot.lane.b32.xlu1 %v606_v43, %s1997_s10 }
 0x855   :  { %v593_v44 = vpop.permute.xlu0 %592 }
 0x858   :  { %v598_v45 = vpop.permute.xlu1 %597 }
 0x859   :  { %v600_v46 = vsel %vm23_vm0, %v593_v44, %v598_v45  ;;  %v603_v54 = vpop.permute.xlu0 %602 }
 0x85a   :  { %1517 = vst.msk [vmem:[%s2308_s3] sm:$0x30] %vm612_vm5, %v600_v46  ;;  %v615_v47 = vrot.slane %v600_v46, 4 }
 0x85c   :  { %1641 = vmatmul.mubr.msk.f32.vlgmr.msra.gmra.mrb[4].mxu0 %vm109_vm3, %v615_v47  ;;  %v608_v53 = vpop.permute.xlu1 %607 }
 0x85d   :  { %1723 = vmatpush3.bf16.msra.mxu0 %v2041_v4  ;;  %1662 = vmatprep.mubr.msk.f32.mxu0 %vm1991_vm1, %v1992_v10  ;;  %v610_v56 = vsel %vm23_vm0, %v603_v54, %v608_v53 }
 0x85e   :  { %1724 = vmatprep.subr.bf16.mxu0 %v1990_v3  ;;  %v741_v58 = vrot.slane %v610_v56, 4  ;;  %v707_v59 = vrot.slane %v610_v56, 6 }
 0x861   :  { %1726 = vmatpush3.bf16.msra.mxu0 %v2058_v11 }
 0x862   :  { %1733 = vmatprep.subr.bf16.mxu0 %v1990_v3 }
 0x92f   :  { %v684_v48 = vpop.f32.mrb[4].mxu0 }
 0x930   :  { %v689_v49 = vrot.slane %v684_v48, 2  ;;  %v692_v50 = vadd.f32 %v2082_v13, %v684_v48  ;;  %v1642_v51 = vpop.f32.mrb[5].mxu0 }
 0x932   :  { %v691_v52 = vadd.f32 %v689_v49, %v2084_v14  ;;  %1822 = vtanh.f32 %v692_v50  ;;  %v1521_v60 = vmul.f32 -1.442695, %v692_v50 }
 0x934   :  { %1824 = vtanh.f32 %v691_v52  ;;  %v1519_v61 = vmul.f32 -1.442695, %v691_v52 }
 0x935   :  { %1826 = vpow2.f32 %v1521_v60 }
 0x936   :  { %1828 = vpow2.f32 %v1519_v61 }
 0x93c   :  { %v1823_v55 = vpop.eup %1822 }
 0x93d   :  { %747 = vrot.lane.b32.xlu0 %v1823_v55, %s1993_s0 }
 0x93e   :  { %v1825_v57 = vpop.eup %1824 }
 0x93f   :  { %713 = vrot.lane.b32.xlu1 %v1825_v57, %s1993_s0  ;;  %v1827_v62 = vpop.eup %1826 }
 0x940   :  { %v1829_v63 = vpop.eup %1828  ;;  %v731_v0 = vadd.f32 1.0, %v1827_v62 }
 0x941   :  { %742 = vrot.lane.b32.xlu0 %v741_v58, %s1997_s10  ;;  %v696_v1 = vadd.f32 1.0, %v1829_v63 }
 0x942   :  { %1830 = vrcp.f32 %v731_v0 }
 0x943   :  { %708 = vrot.lane.b32.xlu1 %v707_v59, %s1994_s7  ;;  %1832 = vrcp.f32 %v696_v1 }
 0x94c   :  { %v1831_v2 = vpop.eup %1830 }
 0x94d   :  { %v1833_v5 = vpop.eup %1832  ;;  %v1522_v6 = vmul.f32 -1.442695, %v1831_v2 }
 0x94e   :  { %v1520_v7 = vmul.f32 -1.442695, %v1833_v5 }
 0x94f   :  { %1834 = vpow2.f32 %v1522_v6 }
 0x950   :  { %1836 = vpow2.f32 %v1520_v7 }
 0x959   :  { %v1835_v8 = vpop.eup %1834 }
 0x95a   :  { %v1837_v9 = vpop.eup %1836  ;;  %v737_v12 = vadd.f32 1.0, %v1835_v8 }
 0x95b   :  { %v702_v15 = vadd.f32 1.0, %v1837_v9 }
 0x95c   :  { %1838 = vrcp.f32 %v737_v12 }
 0x95d   :  { %1840 = vrcp.f32 %v702_v15 }
 0x966   :  { %v1839_v16 = vpop.eup %1838 }
 0x967   :  { %v1841_v19 = vpop.eup %1840 }
 0x9af   :  { %v748_v17 = vpop.permute.xlu0 %747 }
 0x9b0   :  { %v750_v18 = vmul.f32 %v1839_v16, %v748_v17 }
 0x9b1   :  { %v714_v20 = vpop.permute.xlu1 %713 }
 0x9b2   :  { %v716_v21 = vmul.f32 %v1841_v19, %v714_v20  ;;  %752 = vrot.lane.b32.xlu0 %v750_v18, %s1994_s7 }
 0x9b3   :  { %v743_v22 = vpop.permute.xlu0 %742 }
 0x9b4   :  { %718 = vrot.lane.b32.xlu1 %v716_v21, %s1994_s7  ;;  %v745_v24 = vmul.f32 %v1839_v16, %v743_v22 }
 0x9b5   :  { %v709_v23 = vpop.permute.xlu1 %708 }
 0x9b6   :  { %v711_v26 = vmul.f32 %v1841_v19, %v709_v23 }
 0xa24   :  { %v753_v25 = vpop.permute.xlu0 %752 }
 0xa25   :  { %v755_v27 = vadd.f32 %v753_v25, %v745_v24 }
 0xa26   :  { %v719_v28 = vpop.permute.xlu1 %718 }
 0xa27   :  { %1842 = vtanh.f32 %v755_v27  ;;  %v721_v29 = vadd.f32 %v719_v28, %v711_v26  ;;  %v777_v37 = vrot.slane %v755_v27, 2 }
 0xa29   :  { %1844 = vtanh.f32 %v721_v29 }
 0xa31   :  { %v1843_v30 = vpop.eup %1842 }
 0xa32   :  { %758 = vrot.lane.b32.xlu0 %v1843_v30, %s1994_s7 }
 0xa33   :  { %v1845_v31 = vpop.eup %1844 }
 0xa34   :  { %724 = vrot.lane.b32.xlu1 %v1845_v31, %s1994_s7 }
 0xaa4   :  { %v759_v32 = vpop.permute.xlu0 %758 }
 0xaa5   :  { %v761_v33 = vmul.f32 %v1839_v16, %v759_v32 }
 0xaa6   :  { %v725_v34 = vpop.permute.xlu1 %724 }
 0xaa7   :  { %v767_v35 = vrot.slane %v761_v33, 2  ;;  %v727_v36 = vmul.f32 %v1841_v19, %v725_v34 }
 0xaa9   :  { %768 = vrot.lane.b32.xlu1 %v767_v35, %s1995_s8  ;;  %763 = vrot.lane.b32.xlu0 %v727_v36, %s1996_s9 }
 0xaad   :  { %778 = vrot.lane.b32.xlu1 %v777_v37, %s1997_s10  ;;  %773 = vrot.lane.b32.xlu0 %v721_v29, %s1998_s11 }
 0xb1b   :  { %v764_v38 = vpop.permute.xlu0 %763  ;;  %v769_v39 = vpop.permute.xlu1 %768 }
 0xb1c   :  { %v771_v40 = vsel %vm23_vm0, %v764_v38, %v769_v39 }
 0xb1d   :  { %1523 = vst.msk [vmem:[%s2308_s3] sm:$0xc0] %vm783_vm6, %v771_v40  ;;  %v786_v41 = vrot.slane %v771_v40, 6 }
 0xb1f   :  { %1652 = vmatmul.mubr.msk.f32.vlgmr.msra.gmra.mrb[4].mxu1 %vm109_vm3, %v786_v41  ;;  %v774_v47 = vpop.permute.xlu0 %773  ;;  %v779_v48 = vpop.permute.xlu1 %778 }
 0xb20   :  { %1729 = vmatpush3.bf16.msra.mxu1 %v2041_v4  ;;  %1673 = vmatprep.mubr.msk.f32.mxu1 %vm1991_vm1, %v1992_v10  ;;  %v781_v50 = vsel %vm23_vm0, %v774_v47, %v779_v48 }
 0xb21   :  { %1730 = vmatprep.subr.bf16.mxu1 %v1990_v3  ;;  %v878_v52 = vrot.slane %v781_v50, 6 }
 0xb24   :  { %1732 = vmatpush3.bf16.msra.mxu1 %v2058_v11 }
 0xbf2   :  { %v855_v42 = vpop.f32.mrb[4].mxu1 }
 0xbf3   :  { %v859_v43 = vadd.f32 %v2082_v13, %v855_v42  ;;  %v861_v44 = vrot.slane %v855_v42, 2  ;;  %v1653_v45 = vpop.f32.mrb[5].mxu1 }
 0xbf5   :  { %v863_v46 = vadd.f32 %v861_v44, %v2084_v14  ;;  %1846 = vtanh.f32 %v859_v43  ;;  %v1525_v53 = vmul.f32 -1.442695, %v859_v43 }
 0xbf7   :  { %1848 = vtanh.f32 %v863_v46  ;;  %v1527_v54 = vmul.f32 -1.442695, %v863_v46 }
 0xbf8   :  { %1850 = vpow2.f32 %v1525_v53 }
 0xbf9   :  { %1852 = vpow2.f32 %v1527_v54 }
 0xbff   :  { %v1847_v49 = vpop.eup %1846 }
 0xc00   :  { %884 = vrot.lane.b32.xlu1 %v1847_v49, %s1993_s0 }
 0xc01   :  { %v1849_v51 = vpop.eup %1848 }
 0xc02   :  { %917 = vrot.lane.b32.xlu0 %v1849_v51, %s1993_s0  ;;  %v1851_v55 = vpop.eup %1850 }
 0xc03   :  { %v1853_v56 = vpop.eup %1852  ;;  %v867_v57 = vadd.f32 1.0, %v1851_v55 }
 0xc04   :  { %879 = vrot.lane.b32.xlu1 %v878_v52, %s1994_s7  ;;  %v902_v58 = vadd.f32 1.0, %v1853_v56 }
 0xc05   :  { %1854 = vrcp.f32 %v867_v57 }
 0xc06   :  { %912 = vrot.lane.b32.xlu0 %v781_v50, %s1997_s10  ;;  %1856 = vrcp.f32 %v902_v58 }
 0xc0f   :  { %v1855_v59 = vpop.eup %1854 }
 0xc10   :  { %v1857_v60 = vpop.eup %1856  ;;  %v1526_v61 = vmul.f32 -1.442695, %v1855_v59 }
 0xc11   :  { %v1528_v62 = vmul.f32 -1.442695, %v1857_v60 }
 0xc12   :  { %1858 = vpow2.f32 %v1526_v61 }
 0xc13   :  { %1860 = vpow2.f32 %v1528_v62 }
 0xc1c   :  { %v1859_v63 = vpop.eup %1858 }
 0xc1d   :  { %v1861_v0 = vpop.eup %1860  ;;  %v873_v1 = vadd.f32 1.0, %v1859_v63 }
 0xc1e   :  { %v908_v2 = vadd.f32 1.0, %v1861_v0 }
 0xc1f   :  { %1862 = vrcp.f32 %v873_v1 }
 0xc20   :  { %1864 = vrcp.f32 %v908_v2 }
 0xc29   :  { %v1863_v5 = vpop.eup %1862 }
 0xc2a   :  { %v1865_v8 = vpop.eup %1864 }
 0xc72   :  { %v885_v6 = vpop.permute.xlu1 %884 }
 0xc73   :  { %v887_v7 = vmul.f32 %v1863_v5, %v885_v6 }
 0xc74   :  { %v918_v9 = vpop.permute.xlu0 %917 }
 0xc75   :  { %889 = vrot.lane.b32.xlu1 %v887_v7, %s1994_s7  ;;  %v920_v12 = vmul.f32 %v1865_v8, %v918_v9 }
 0xc76   :  { %v880_v15 = vpop.permute.xlu1 %879 }
 0xc77   :  { %922 = vrot.lane.b32.xlu0 %v920_v12, %s1994_s7  ;;  %v882_v16 = vmul.f32 %v1863_v5, %v880_v15 }
 0xc78   :  { %v913_v17 = vpop.permute.xlu0 %912 }
 0xc79   :  { %v915_v20 = vmul.f32 %v1865_v8, %v913_v17 }
 0xce7   :  { %v890_v18 = vpop.permute.xlu1 %889 }
 0xce8   :  { %v892_v19 = vadd.f32 %v890_v18, %v882_v16 }
 0xce9   :  { %v923_v21 = vpop.permute.xlu0 %922 }
 0xcea   :  { %1866 = vtanh.f32 %v892_v19  ;;  %v925_v22 = vadd.f32 %v923_v21, %v915_v20 }
 0xcec   :  { %1868 = vtanh.f32 %v925_v22  ;;  %v947_v30 = vrot.slane %v925_v22, 6 }
 0xcf4   :  { %v1867_v23 = vpop.eup %1866 }
 0xcf5   :  { %895 = vrot.lane.b32.xlu1 %v1867_v23, %s1994_s7 }
 0xcf6   :  { %v1869_v24 = vpop.eup %1868 }
 0xcf7   :  { %928 = vrot.lane.b32.xlu0 %v1869_v24, %s1994_s7 }
 0xd67   :  { %v896_v25 = vpop.permute.xlu1 %895 }
 0xd68   :  { %v898_v26 = vmul.f32 %v1863_v5, %v896_v25 }
 0xd69   :  { %v929_v27 = vpop.permute.xlu0 %928 }
 0xd6a   :  { %933 = vrot.lane.b32.xlu0 %v898_v26, %s1996_s9  ;;  %v931_v28 = vmul.f32 %v1865_v8, %v929_v27 }
 0xd6c   :  { %v937_v29 = vrot.slane %v931_v28, 6 }
 0xd6e   :  { %943 = vrot.lane.b32.xlu0 %v892_v19, %s1998_s11  ;;  %938 = vrot.lane.b32.xlu1 %v937_v29, %s1995_s8 }
 0xd72   :  { %948 = vrot.lane.b32.xlu1 %v947_v30, %s1997_s10 }
 0xddc   :  { %v934_v31 = vpop.permute.xlu0 %933 }
 0xde0   :  { %v939_v32 = vpop.permute.xlu1 %938  ;;  %v944_v41 = vpop.permute.xlu0 %943 }
 0xde1   :  { %v941_v33 = vsel %vm23_vm0, %v934_v31, %v939_v32 }
 0xde2   :  { %1529 = vst.msk [vmem:[%s2308_s3 + $0x8] sm:$0x3] %vm268_vm2, %v941_v33  ;;  %1663 = vmatmul.mubr.msk.f32.vlgmr.msra.gmra.mrb[6].mxu0 %vm109_vm3, %v941_v33 }
 0xde3   :  { %1735 = vmatpush3.bf16.msra.mxu0 %v2041_v4  ;;  %1684 = vmatprep.mubr.msk.f32.mxu0 %vm1991_vm1, %v1992_v10 }
 0xde4   :  { %1736 = vmatprep.subr.bf16.mxu0 %v1990_v3  ;;  %v949_v40 = vpop.permute.xlu1 %948 }
 0xde5   :  { %v951_v42 = vsel %vm23_vm0, %v944_v41, %v949_v40 }
 0xde6   :  { %v1048_v3 = vrot.slane %v951_v42, 6 }
 0xde7   :  { %1738 = vmatpush3.bf16.msra.mxu0 %v2058_v11  ;;  %v1082_v11 = vrot.slane %v951_v42, 4 }
 0xeb5   :  { %v1023_v34 = vpop.f32.mrb[6].mxu0 }
 0xeb6   :  { %v1028_v35 = vrot.slane %v1023_v34, 6  ;;  %v1031_v36 = vrot.slane %v1023_v34, 4  ;;  %v1664_v37 = vpop.f32.mrb[7].mxu0 }
 0xeb8   :  { %v1030_v38 = vadd.f32 %v2082_v13, %v1028_v35  ;;  %v1033_v39 = vadd.f32 %v1031_v36, %v2084_v14 }
 0xeba   :  { %1870 = vtanh.f32 %v1030_v38  ;;  %v1531_v43 = vmul.f32 -1.442695, %v1030_v38  ;;  %v1533_v44 = vmul.f32 -1.442695, %v1033_v39 }
 0xebb   :  { %1872 = vtanh.f32 %v1033_v39 }
 0xebc   :  { %1874 = vpow2.f32 %v1531_v43 }
 0xebd   :  { %1876 = vpow2.f32 %v1533_v44 }
 0xec4   :  { %v1871_v4 = vpop.eup %1870 }
 0xec5   :  { %v1873_v10 = vpop.eup %1872  ;;  %1054 = vrot.lane.b32.xlu1 %v1871_v4, %s1993_s0 }
 0xec6   :  { %1088 = vrot.lane.b32.xlu0 %v1873_v10, %s1993_s0  ;;  %v1875_v45 = vpop.eup %1874 }
 0xec7   :  { %v1877_v46 = vpop.eup %1876  ;;  %v1037_v47 = vadd.f32 1.0, %v1875_v45 }
 0xec8   :  { %v1072_v48 = vadd.f32 1.0, %v1877_v46 }
 0xec9   :  { %1049 = vrot.lane.b32.xlu1 %v1048_v3, %s1994_s7  ;;  %1878 = vrcp.f32 %v1037_v47 }
 0xeca   :  { %1083 = vrot.lane.b32.xlu0 %v1082_v11, %s1997_s10  ;;  %1880 = vrcp.f32 %v1072_v48 }
 0xed3   :  { %v1879_v49 = vpop.eup %1878 }
 0xed4   :  { %v1881_v50 = vpop.eup %1880  ;;  %v1532_v51 = vmul.f32 -1.442695, %v1879_v49 }
 0xed5   :  { %v1534_v52 = vmul.f32 -1.442695, %v1881_v50 }
 0xed6   :  { %1882 = vpow2.f32 %v1532_v51 }
 0xed7   :  { %1884 = vpow2.f32 %v1534_v52 }
 0xee0   :  { %v1883_v53 = vpop.eup %1882 }
 0xee1   :  { %v1885_v54 = vpop.eup %1884  ;;  %v1043_v55 = vadd.f32 1.0, %v1883_v53 }
 0xee2   :  { %v1078_v56 = vadd.f32 1.0, %v1885_v54 }
 0xee3   :  { %1886 = vrcp.f32 %v1043_v55 }
 0xee4   :  { %1888 = vrcp.f32 %v1078_v56 }
 0xeed   :  { %v1887_v57 = vpop.eup %1886 }
 0xeee   :  { %v1889_v59 = vpop.eup %1888 }
 0xf37   :  { %v1055_v58 = vpop.permute.xlu1 %1054 }
 0xf38   :  { %v1089_v60 = vpop.permute.xlu0 %1088  ;;  %v1057_v61 = vmul.f32 %v1887_v57, %v1055_v58 }
 0xf39   :  { %v1091_v62 = vmul.f32 %v1889_v59, %v1089_v60 }
 0xf3a   :  { %1059 = vrot.lane.b32.xlu1 %v1057_v61, %s1994_s7 }
 0xf3b   :  { %1093 = vrot.lane.b32.xlu0 %v1091_v62, %s1994_s7  ;;  %v1050_v63 = vpop.permute.xlu1 %1049 }
 0xf3c   :  { %v1084_v0 = vpop.permute.xlu0 %1083  ;;  %v1052_v1 = vmul.f32 %v1887_v57, %v1050_v63 }
 0xf3d   :  { %v1086_v2 = vmul.f32 %v1889_v59, %v1084_v0 }
 0xfac   :  { %v1060_v5 = vpop.permute.xlu1 %1059 }
 0xfad   :  { %v1094_v6 = vpop.permute.xlu0 %1093  ;;  %v1062_v7 = vadd.f32 %v1060_v5, %v1052_v1 }
 0xfae   :  { %v1096_v8 = vadd.f32 %v1094_v6, %v1086_v2 }
 0xfaf   :  { %1890 = vtanh.f32 %v1062_v7 }
 0xfb0   :  { %1892 = vtanh.f32 %v1096_v8  ;;  %v1118_v20 = vrot.slane %v1096_v8, 2 }
 0xfb9   :  { %v1891_v9 = vpop.eup %1890 }
 0xfba   :  { %v1893_v12 = vpop.eup %1892  ;;  %1065 = vrot.lane.b32.xlu1 %v1891_v9, %s1994_s7 }
 0xfbb   :  { %1099 = vrot.lane.b32.xlu0 %v1893_v12, %s1994_s7 }
0x102c   :  { %v1066_v15 = vpop.permute.xlu1 %1065 }
0x102d   :  { %v1100_v16 = vpop.permute.xlu0 %1099  ;;  %v1068_v17 = vmul.f32 %v1887_v57, %v1066_v15 }
0x102e   :  { %v1102_v18 = vmul.f32 %v1889_v59, %v1100_v16 }
0x102f   :  { %1104 = vrot.lane.b32.xlu0 %v1068_v17, %s1996_s9 }
0x1030   :  { %v1108_v19 = vrot.slane %v1102_v18, 2 }
0x1032   :  { %1109 = vrot.lane.b32.xlu1 %v1108_v19, %s1995_s8 }
0x1033   :  { %1114 = vrot.lane.b32.xlu0 %v1062_v7, %s1998_s11 }
0x1036   :  { %1119 = vrot.lane.b32.xlu1 %v1118_v20, %s1997_s10 }
0x10a1   :  { %v1105_v21 = vpop.permute.xlu0 %1104 }
0x10a4   :  { %v1110_v22 = vpop.permute.xlu1 %1109 }
0x10a5   :  { %v1112_v23 = vsel %vm23_vm0, %v1105_v21, %v1110_v22  ;;  %v1115_v32 = vpop.permute.xlu0 %1114 }
0x10a6   :  { %1535 = vst.msk [vmem:[%s2308_s3 + $0x8] sm:$0xc] %vm440_vm4, %v1112_v23  ;;  %v1126_v24 = vrot.slane %v1112_v23, 2 }
0x10a8   :  { %1674 = vmatmul.mubr.msk.f32.vlgmr.msra.gmra.mrb[6].mxu1 %vm109_vm3, %v1126_v24  ;;  %v1120_v31 = vpop.permute.xlu1 %1119 }
0x10a9   :  { %v1122_v34 = vsel %vm23_vm0, %v1115_v32, %v1120_v31 }
0x10aa   :  { %v1220_v36 = vrot.slane %v1122_v34, 6 }
0x117b   :  { %v1195_v25 = vpop.f32.mrb[6].mxu1 }
0x117c   :  { %v1200_v26 = vrot.slane %v1195_v25, 4  ;;  %v1203_v27 = vrot.slane %v1195_v25, 6  ;;  %v1675_v28 = vpop.f32.mrb[7].mxu1 }
0x117e   :  { %v1202_v29 = vadd.f32 %v2082_v13, %v1200_v26  ;;  %v1205_v30 = vadd.f32 %v1203_v27, %v2084_v14 }
0x1180   :  { %1894 = vtanh.f32 %v1202_v29  ;;  %v1537_v37 = vmul.f32 -1.442695, %v1202_v29  ;;  %v1539_v38 = vmul.f32 -1.442695, %v1205_v30 }
0x1181   :  { %1896 = vtanh.f32 %v1205_v30 }
0x1182   :  { %1898 = vpow2.f32 %v1537_v37 }
0x1183   :  { %1900 = vpow2.f32 %v1539_v38 }
0x118a   :  { %v1895_v33 = vpop.eup %1894 }
0x118b   :  { %v1897_v35 = vpop.eup %1896  ;;  %1226 = vrot.lane.b32.xlu1 %v1895_v33, %s1993_s0 }
0x118c   :  { %1259 = vrot.lane.b32.xlu0 %v1897_v35, %s1993_s0  ;;  %v1899_v39 = vpop.eup %1898 }
0x118d   :  { %v1901_v40 = vpop.eup %1900  ;;  %v1209_v41 = vadd.f32 1.0, %v1899_v39 }
0x118e   :  { %v1244_v4 = vadd.f32 1.0, %v1901_v40 }
0x118f   :  { %1221 = vrot.lane.b32.xlu1 %v1220_v36, %s1994_s7  ;;  %1902 = vrcp.f32 %v1209_v41 }
0x1190   :  { %1254 = vrot.lane.b32.xlu0 %v1122_v34, %s1997_s10  ;;  %1904 = vrcp.f32 %v1244_v4 }
0x1199   :  { %v1903_v42 = vpop.eup %1902 }
0x119a   :  { %v1905_v10 = vpop.eup %1904  ;;  %v1538_v3 = vmul.f32 -1.442695, %v1903_v42 }
0x119b   :  { %v1540_v11 = vmul.f32 -1.442695, %v1905_v10 }
0x119c   :  { %1906 = vpow2.f32 %v1538_v3 }
0x119d   :  { %1908 = vpow2.f32 %v1540_v11 }
0x11a6   :  { %v1907_v43 = vpop.eup %1906 }
0x11a7   :  { %v1909_v44 = vpop.eup %1908  ;;  %v1215_v45 = vadd.f32 1.0, %v1907_v43 }
0x11a8   :  { %v1250_v46 = vadd.f32 1.0, %v1909_v44 }
0x11a9   :  { %1910 = vrcp.f32 %v1215_v45 }
0x11aa   :  { %1912 = vrcp.f32 %v1250_v46 }
0x11b3   :  { %v1911_v47 = vpop.eup %1910 }
0x11b4   :  { %v1913_v49 = vpop.eup %1912 }
0x11fd   :  { %v1227_v48 = vpop.permute.xlu1 %1226 }
0x11fe   :  { %v1260_v50 = vpop.permute.xlu0 %1259  ;;  %v1229_v51 = vmul.f32 %v1911_v47, %v1227_v48 }
0x11ff   :  { %v1262_v52 = vmul.f32 %v1913_v49, %v1260_v50 }
0x1200   :  { %1231 = vrot.lane.b32.xlu1 %v1229_v51, %s1994_s7 }
0x1201   :  { %1264 = vrot.lane.b32.xlu0 %v1262_v52, %s1994_s7  ;;  %v1222_v53 = vpop.permute.xlu1 %1221 }
0x1202   :  { %v1255_v54 = vpop.permute.xlu0 %1254  ;;  %v1224_v55 = vmul.f32 %v1911_v47, %v1222_v53 }
0x1203   :  { %v1257_v56 = vmul.f32 %v1913_v49, %v1255_v54 }
0x1272   :  { %v1232_v57 = vpop.permute.xlu1 %1231 }
0x1273   :  { %v1265_v58 = vpop.permute.xlu0 %1264  ;;  %v1234_v59 = vadd.f32 %v1232_v57, %v1224_v55 }
0x1274   :  { %v1267_v60 = vadd.f32 %v1265_v58, %v1257_v56 }
0x1275   :  { %1914 = vtanh.f32 %v1234_v59 }
0x1276   :  { %1916 = vtanh.f32 %v1267_v60  ;;  %v1289_v6 = vrot.slane %v1267_v60, 6 }
0x127f   :  { %v1915_v61 = vpop.eup %1914 }
0x1280   :  { %v1917_v62 = vpop.eup %1916  ;;  %1237 = vrot.lane.b32.xlu1 %v1915_v61, %s1994_s7 }
0x1281   :  { %1270 = vrot.lane.b32.xlu0 %v1917_v62, %s1994_s7 }
0x12f2   :  { %v1238_v63 = vpop.permute.xlu1 %1237 }
0x12f3   :  { %v1271_v0 = vpop.permute.xlu0 %1270  ;;  %v1240_v1 = vmul.f32 %v1911_v47, %v1238_v63 }
0x12f4   :  { %v1273_v2 = vmul.f32 %v1913_v49, %v1271_v0 }
0x12f5   :  { %1275 = vrot.lane.b32.xlu0 %v1240_v1, %s1996_s9 }
0x12f6   :  { %v1279_v5 = vrot.slane %v1273_v2, 6 }
0x12f8   :  { %1280 = vrot.lane.b32.xlu1 %v1279_v5, %s1995_s8 }
0x12f9   :  { %1285 = vrot.lane.b32.xlu0 %v1234_v59, %s1998_s11 }
0x12fc   :  { %1290 = vrot.lane.b32.xlu1 %v1289_v6, %s1997_s10 }
0x1367   :  { %v1276_v7 = vpop.permute.xlu0 %1275 }
0x136a   :  { %v1281_v8 = vpop.permute.xlu1 %1280 }
0x136b   :  { %v1283_v9 = vsel %vm23_vm0, %v1276_v7, %v1281_v8  ;;  %v1286_v21 = vpop.permute.xlu0 %1285 }
0x136c   :  { %1541 = vst.msk [vmem:[%s2308_s3 + $0x8] sm:$0x30] %vm612_vm5, %v1283_v9  ;;  %v1297_v12 = vrot.slane %v1283_v9, 4 }
0x136e   :  { %1685 = vmatmul.mubr.msk.f32.vlgmr.msra.gmra.mrb[8].mxu0 %vm109_vm3, %v1297_v12  ;;  %v1291_v20 = vpop.permute.xlu1 %1290 }
0x136f   :  { %v1293_v23 = vsel %vm23_vm0, %v1286_v21, %v1291_v20 }
0x1370   :  { %v1423_v25 = vrot.slane %v1293_v23, 4  ;;  %v1389_v26 = vrot.slane %v1293_v23, 6 }
0x1441   :  { %v1366_v15 = vpop.f32.mrb[8].mxu0 }
0x1442   :  { %v1371_v16 = vrot.slane %v1366_v15, 2  ;;  %v1374_v17 = vadd.f32 %v1366_v15, %v2084_v14  ;;  %v1686_v18 = vpop.f32.mrb[9].mxu0 }
0x1444   :  { %v1373_v19 = vadd.f32 %v2082_v13, %v1371_v16  ;;  %1918 = vtanh.f32 %v1374_v17  ;;  %v1545_v14 = vmul.f32 -1.442695, %v1374_v17 }
0x1446   :  { %1920 = vtanh.f32 %v1373_v19  ;;  %v1543_v13 = vmul.f32 -1.442695, %v1373_v19 }
0x1447   :  { %1922 = vpow2.f32 %v1545_v14 }
0x1448   :  { %1924 = vpow2.f32 %v1543_v13 }
0x144e   :  { %v1919_v22 = vpop.eup %1918 }
0x144f   :  { %1429 = vrot.lane.b32.xlu0 %v1919_v22, %s1993_s0 }
0x1450   :  { %v1921_v24 = vpop.eup %1920 }
0x1451   :  { %1395 = vrot.lane.b32.xlu1 %v1921_v24, %s1993_s0  ;;  %v1923_v27 = vpop.eup %1922 }
0x1452   :  { %v1925_v28 = vpop.eup %1924  ;;  %v1413_v29 = vadd.f32 1.0, %v1923_v27 }
0x1453   :  { %1424 = vrot.lane.b32.xlu0 %v1423_v25, %s1997_s10  ;;  %v1378_v30 = vadd.f32 1.0, %v1925_v28 }
0x1454   :  { %1926 = vrcp.f32 %v1413_v29 }
0x1455   :  { %1390 = vrot.lane.b32.xlu1 %v1389_v26, %s1994_s7  ;;  %1928 = vrcp.f32 %v1378_v30 }
0x145e   :  { %v1927_v31 = vpop.eup %1926 }
0x145f   :  { %v1929_v32 = vpop.eup %1928  ;;  %v1546_v33 = vmul.f32 -1.442695, %v1927_v31 }
0x1460   :  { %v1544_v34 = vmul.f32 -1.442695, %v1929_v32 }
0x1461   :  { %1930 = vpow2.f32 %v1546_v33 }
0x1462   :  { %1932 = vpow2.f32 %v1544_v34 }
0x146b   :  { %v1931_v35 = vpop.eup %1930 }
0x146c   :  { %v1933_v36 = vpop.eup %1932  ;;  %v1419_v37 = vadd.f32 1.0, %v1931_v35 }
0x146d   :  { %v1384_v38 = vadd.f32 1.0, %v1933_v36 }
0x146e   :  { %1934 = vrcp.f32 %v1419_v37 }
0x146f   :  { %1936 = vrcp.f32 %v1384_v38 }
0x1478   :  { %v1935_v39 = vpop.eup %1934 }
0x1479   :  { %v1937_v4 = vpop.eup %1936 }
0x14c1   :  { %v1430_v40 = vpop.permute.xlu0 %1429 }
0x14c2   :  { %v1432_v41 = vmul.f32 %v1935_v39, %v1430_v40 }
0x14c3   :  { %v1396_v42 = vpop.permute.xlu1 %1395 }
0x14c4   :  { %v1398_v10 = vmul.f32 %v1937_v4, %v1396_v42  ;;  %1434 = vrot.lane.b32.xlu0 %v1432_v41, %s1994_s7 }
0x14c5   :  { %v1425_v3 = vpop.permute.xlu0 %1424 }
0x14c6   :  { %1400 = vrot.lane.b32.xlu1 %v1398_v10, %s1994_s7  ;;  %v1427_v43 = vmul.f32 %v1935_v39, %v1425_v3 }
0x14c7   :  { %v1391_v11 = vpop.permute.xlu1 %1390 }
0x14c8   :  { %v1393_v45 = vmul.f32 %v1937_v4, %v1391_v11 }
0x1536   :  { %v1435_v44 = vpop.permute.xlu0 %1434 }
0x1537   :  { %v1437_v46 = vadd.f32 %v1435_v44, %v1427_v43 }
0x1538   :  { %v1401_v47 = vpop.permute.xlu1 %1400 }
0x1539   :  { %1938 = vtanh.f32 %v1437_v46  ;;  %v1403_v48 = vadd.f32 %v1401_v47, %v1393_v45  ;;  %v1459_v56 = vrot.slane %v1437_v46, 2 }
0x153b   :  { %1940 = vtanh.f32 %v1403_v48 }
0x1543   :  { %v1939_v49 = vpop.eup %1938 }
0x1544   :  { %1440 = vrot.lane.b32.xlu0 %v1939_v49, %s1994_s7 }
0x1545   :  { %v1941_v50 = vpop.eup %1940 }
0x1546   :  { %1406 = vrot.lane.b32.xlu1 %v1941_v50, %s1994_s7 }
0x15b6   :  { %v1441_v51 = vpop.permute.xlu0 %1440 }
0x15b7   :  { %v1443_v52 = vmul.f32 %v1935_v39, %v1441_v51 }
0x15b8   :  { %v1407_v53 = vpop.permute.xlu1 %1406 }
0x15b9   :  { %v1449_v54 = vrot.slane %v1443_v52, 2  ;;  %v1409_v55 = vmul.f32 %v1937_v4, %v1407_v53 }
0x15bb   :  { %1450 = vrot.lane.b32.xlu1 %v1449_v54, %s1995_s8  ;;  %1445 = vrot.lane.b32.xlu0 %v1409_v55, %s1996_s9 }
0x15bf   :  { %1460 = vrot.lane.b32.xlu1 %v1459_v56, %s1997_s10  ;;  %1455 = vrot.lane.b32.xlu0 %v1403_v48, %s1998_s11 }
0x162d   :  { %v1446_v57 = vpop.permute.xlu0 %1445  ;;  %v1451_v58 = vpop.permute.xlu1 %1450 }
0x162e   :  { %v1453_v59 = vsel %vm23_vm0, %v1446_v57, %v1451_v58 }
0x162f   :  { %1547 = vst.msk [vmem:[%s2308_s3 + $0x8] sm:$0xc0] %vm783_vm6, %v1453_v59  ;;  %1466 = vst.msk [vmem:[#allocation2 - $0x6] sm:$0xc0] %vm783_vm6, %v1453_v59 }
0x1630   :  { %1953 = shalt.err (!%p1950_p4)
}
0x1631   :  { %s1954_s7 = scalar_lea.hbm %s2309_s4, 32 }
0x1632   :  { %p1955_p5 = scmp.ne.s32.totalorder %s2309_s4, %s1954_s7  ;;  %p1958_p6 = scmp.lt.u32.totalorder %s1954_s7, %s2309_s4 }
0x1634   :  { %p1960_p7 = pnand %p1958_p6, %p1955_p5 }
0x1636   :  { %1963 = shalt.err (!%p1960_p7)
}
0x1637   :  { %1479 = dma.vmem_to_hbm [thread:$0]  %s1477_s27, 32, %s2309_s4, [#allocation3]   ;;  %v1456_v60 = vpop.permute.xlu0 %1455  ;;  %v1461_v61 = vpop.permute.xlu1 %1460 }
0x1638   :  { %v1463_v62 = vsel %vm23_vm0, %v1456_v60, %v1461_v61  ;;  %s1964_s13 = scalar_lea.vmem %s1487_s29, 32  ;;  %p1969_p9 = scmp.lt.s32.totalorder %s1487_s29, %s1487_s29 }
0x1639   :  { %1467 = vst.msk [vmem:[#allocation4 - $0x6] sm:$0xc0] %vm783_vm6, %v1463_v62  ;;  %p1965_p8 = scmp.ne.s32.totalorder %s1487_s29, %s1964_s13  ;;  %p1970_p10 = scmp.lt.s32.totalorder %s1964_s13, %s1964_s13 }
0x163b   :  { %p1971_p11 = por %p1970_p10, %p1969_p9 }
0x163d   :  { %p1972_p12 = pnand %p1971_p11, %p1965_p8 }
0x163f   :  { %1975 = shalt.err (!%p1972_p12)
}
0x1640   :  { %s1976_s16 = scalar_lea.hbm %s2310_s5, 32 }
0x1641   :  { %p1977_p13 = scmp.ne.s32.totalorder %s2310_s5, %s1976_s16  ;;  %p1980_p0 = scmp.lt.u32.totalorder %s1976_s16, %s2310_s5 }
0x1643   :  { %p1982_p1 = pnand %p1980_p0, %p1977_p13 }
0x1645   :  { %1985 = shalt.err (!%p1982_p1)
}
0x1646   :  { %1489 = dma.vmem_to_hbm [thread:$0]  %s1487_s29, 32, %s2310_s5, [#allocation5]  }
0x1647   :  { %1986 = dma.done.wait [#allocation3], 32  }
0x1648   :  { %1987 = vsyncadd [#allocation3], 4294967264 }
0x1649   :  { %1988 = dma.done.wait [#allocation5], 32  }
0x164a   :  { %1989 = vsyncadd [#allocation5], 4294967264 }
0x164b   :  { %1498 = vsyncpa [#allocation3], 1 }
0x164c   :  { %1499 = vsyncpa [#allocation5], 1 }

</bundles_post_ra>
